<compile_context>
chip_gen: v5e
topology: v5e:2x2
jax: 0.10.0
libtpu: 0.0.40
codegen_flags: <defaults>
</compile_context>

<pallas_src>
import jax
import jax.numpy as jnp
from jax.experimental import pallas as pl
from jax.experimental.pallas import tpu as pltpu

D_IN = 32
H1 = 1024
H2 = 512
LN_EPS = 1e-5


# ----------------------------------------------------------------------------
# Per-chip tuning
# ----------------------------------------------------------------------------
def _tpu_config():
    """Returns (default batch tile, vmem_limit_bytes or None, fc2-on-MXU?)."""
    try:
        kind = jax.devices()[0].device_kind.lower()
    except Exception:
        kind = ""
    if "v7" in kind:
        # 64 MiB physical VMEM: cap the tile and the scoped limit; VALU binds
        # -> offload fc2 to the MXU.
        return 1024, 48 * 1024 * 1024, True
    if "v6" in kind:
        # 128 MiB physical VMEM: big tile; VALU binds -> fc2 on MXU.
        return 2048, 64 * 1024 * 1024, True
    if "v5" in kind:
        # 128 MiB physical VMEM: big tile; MXU binds -> keep fc2 on VPU/XLU.
        return 2048, 64 * 1024 * 1024, False
    # Unknown chip: conservative tile, default scoped VMEM.
    return 512, None, True


def _round_up(n, m):
    return -(-n // m) * m


def _choose_tb(B, default_tb):
    """Pick the batch tile.

    - Large B: fixed default tile (many grid steps -> pipelining + megacore).
    - 64 < B <= 2*default_tb: exactly two tiles so both TensorCores are used.
    - Tiny B: one tile, rounded up to the sublane multiple of 8.
    """
    if B >= 2 * default_tb:
        return default_tb
    if B > 64:
        return max(8, _round_up(-(-B // 2), 8))
    return max(8, _round_up(B, 8))


# ----------------------------------------------------------------------------
# Kernel
# ----------------------------------------------------------------------------
def _layernorm_1pass(h, gamma, beta):
    """LayerNorm with a single pass over h: var = E[h^2] - mean^2 (all f32)."""
    inv_n = 1.0 / h.shape[-1]
    s = jnp.sum(h, axis=-1, keepdims=True)
    ss = jnp.sum(h * h, axis=-1, keepdims=True)
    mu = s * inv_n
    var = jnp.maximum(ss * inv_n - mu * mu, 0.0)
    return (h - mu) * jax.lax.rsqrt(var + LN_EPS) * gamma + beta


def _make_kernel(use_mxu_fc2):
    def fc_base_kernel(x_ref,
                       w0_ref, b0_ref, g1_ref, be1_ref,
                       w1_ref, b1_ref, g2_ref, be2_ref,
                       w2_ref, b2_ref,
                       o_ref):
        # Hoist parameter reads once (avoid re-materialized broadcasts).
        b0 = b0_ref[...]
        g1 = g1_ref[...]
        be1 = be1_ref[...]
        b1 = b1_ref[...]
        g2 = g2_ref[...]
        be2 = be2_ref[...]
        b2 = b2_ref[...]

        # fc0 -> ln1 -> relu   (x already bf16 from host; f32 MXU accumulation)
        h = jnp.dot(x_ref[...], w0_ref[...],
                    preferred_element_type=jnp.float32) + b0
        h = _layernorm_1pass(h, g1, be1)
        h = jnp.maximum(h, 0.0)

        # fc1 -> ln2 -> relu
        h = jnp.dot(h.astype(jnp.bfloat16), w1_ref[...],
                    preferred_element_type=jnp.float32) + b1
        h = _layernorm_1pass(h, g2, be2)
        h = jnp.maximum(h, 0.0)

        if use_mxu_fc2:
            # fc2 on the MXU (slack slot on v6e/v7x): (tb, 512) @ (512, 1),
            # bf16 operands, f32 accumulation. w2_ref is the bf16 column.
            out = jnp.dot(h.astype(jnp.bfloat16), w2_ref[...],
                          preferred_element_type=jnp.float32) + b2
        else:
            # fc2 on the VPU/XLU (v5e: MXU is the binding unit): multiply by
            # the (1, H2) f32 row + a single cross-lane reduce.
            out = jnp.sum(h * w2_ref[...], axis=-1, keepdims=True) + b2

        o_ref[...] = out.astype(o_ref.dtype)

    return fc_base_kernel


# ----------------------------------------------------------------------------
# Wrapper
# ----------------------------------------------------------------------------
def fc_base_forward(x, params, *, tb=None):
    B, d_in = x.shape
    assert d_in == D_IN

    (w0, b0, g1, be1, w1, b1, g2, be2, w2, b2) = params
    assert w0.shape == (D_IN, H1) and w1.shape == (H1, H2) and w2.shape == (1, H2)

    default_tb, vmem_limit, use_mxu_fc2 = _tpu_config()
    if tb is None:
        tb = _choose_tb(B, default_tb)

    # Pad the batch so the grid divides evenly; slice the result afterwards.
    n_tiles = pl.cdiv(B, tb)
    B_pad = n_tiles * tb

    # bf16 matmul operands prepared host-side (halves x/weight DMA, removes
    # the in-kernel VPU cast of x).
    x_in = x.astype(jnp.bfloat16)
    if B_pad != B:
        x_in = jnp.pad(x_in, ((0, B_pad - B), (0, 0)))
    w0_bf = w0.astype(jnp.bfloat16)
    w1_bf = w1.astype(jnp.bfloat16)

    full = lambda i: (0, 0)  # params: same whole-array block every grid step

    if use_mxu_fc2:
        w2_in = w2.reshape(H2, 1).astype(jnp.bfloat16)   # (512, 1) column
        w2_spec = pl.BlockSpec((H2, 1), full)
    else:
        w2_in = w2                                        # (1, 512) f32 row
        w2_spec = pl.BlockSpec((1, H2), full)

    cp_kwargs = {"dimension_semantics": ("parallel",)}
    if vmem_limit is not None:
        cp_kwargs["vmem_limit_bytes"] = vmem_limit

    out2d = pl.pallas_call(
        _make_kernel(use_mxu_fc2),
        out_shape=jax.ShapeDtypeStruct((B_pad, 1), jnp.float32),
        grid_spec=pltpu.PrefetchScalarGridSpec(
            num_scalar_prefetch=0,
            grid=(n_tiles,),
            in_specs=[
                pl.BlockSpec((tb, D_IN), lambda i: (i, 0)),   # x tile (bf16)
                pl.BlockSpec((D_IN, H1), full),               # w0 (bf16)
                pl.BlockSpec((1, H1), full),                  # b0
                pl.BlockSpec((1, H1), full),                  # ln1 gamma
                pl.BlockSpec((1, H1), full),                  # ln1 beta
                pl.BlockSpec((H1, H2), full),                 # w1 (bf16)
                pl.BlockSpec((1, H2), full),                  # b1
                pl.BlockSpec((1, H2), full),                  # ln2 gamma
                pl.BlockSpec((1, H2), full),                  # ln2 beta
                w2_spec,                                      # w2
                pl.BlockSpec((1, 1), full),                   # b2
            ],
            out_specs=pl.BlockSpec((tb, 1), lambda i: (i, 0)),
        ),
        compiler_params=pltpu.CompilerParams(**cp_kwargs),
    )(x_in, w0_bf, b0, g1, be1, w1_bf, b1, g2, be2, w2_in, b2)

    # torch.flatten(x): (B, 1) -> (B,)  (drop batch padding if any)
    return out2d.reshape(-1)[:B]


# ----------------------------------------------------------------------------
# Params & references
# ----------------------------------------------------------------------------
def init_params(key):
    """nn.Linear-style init (uniform +-1/sqrt(fan_in)); LayerNorm gamma=1,
    beta=0. Linear weights stored as (in, out); fc2 kept as a (1, H2) row."""
    ks = jax.random.split(key, 6)

    def linear(kw, kb, fan_in, fan_out):
        bound = 1.0 / jnp.sqrt(fan_in)
        w = jax.random.uniform(kw, (fan_in, fan_out), jnp.float32, -bound, bound)
        b = jax.random.uniform(kb, (1, fan_out), jnp.float32, -bound, bound)
        return w, b

    w0, b0 = linear(ks[0], ks[1], D_IN, H1)
    w1, b1 = linear(ks[2], ks[3], H1, H2)
    w2_col, b2 = linear(ks[4], ks[5], H2, 1)
    w2 = w2_col.reshape(1, H2)

    g1 = jnp.ones((1, H1), jnp.float32)
    be1 = jnp.zeros((1, H1), jnp.float32)
    g2 = jnp.ones((1, H2), jnp.float32)
    be2 = jnp.zeros((1, H2), jnp.float32)
    return (w0, b0, g1, be1, w1, b1, g2, be2, w2, b2)


def _layernorm_2pass(h, gamma, beta):
    mu = jnp.mean(h, axis=-1, keepdims=True)
    var = jnp.mean((h - mu) * (h - mu), axis=-1, keepdims=True)
    return (h - mu) * jax.lax.rsqrt(var + LN_EPS) * gamma + beta


def reference_forward_f32(x, params):
    """PyTorch-equivalent reference: full f32 matmuls, two-pass LayerNorm."""
    (w0, b0, g1, be1, w1, b1, g2, be2, w2, b2) = params
    h = x @ w0 + b0
    h = _layernorm_2pass(h, g1, be1)
    h = jnp.maximum(h, 0.0)
    h = h @ w1 + b1
    h = _layernorm_2pass(h, g2, be2)
    h = jnp.maximum(h, 0.0)
    out = h @ w2.T + b2
    return out.reshape(-1)


def reference_forward_matched(x, params, use_mxu_fc2):
    """Same precision recipe as the kernel (bf16 MXU operands, 1-pass LN,
    chip-matched fc2 path)."""
    (w0, b0, g1, be1, w1, b1, g2, be2, w2, b2) = params
    h = jnp.dot(x.astype(jnp.bfloat16), w0.astype(jnp.bfloat16),
                preferred_element_type=jnp.float32) + b0
    h = _layernorm_1pass(h, g1, be1)
    h = jnp.maximum(h, 0.0)
    h = jnp.dot(h.astype(jnp.bfloat16), w1.astype(jnp.bfloat16),
                preferred_element_type=jnp.float32) + b1
    h = _layernorm_1pass(h, g2, be2)
    h = jnp.maximum(h, 0.0)
    if use_mxu_fc2:
        out = jnp.dot(h.astype(jnp.bfloat16),
                      w2.reshape(H2, 1).astype(jnp.bfloat16),
                      preferred_element_type=jnp.float32) + b2
    else:
        out = jnp.sum(h * w2, axis=-1, keepdims=True) + b2
    return out.reshape(-1)


# ----------------------------------------------------------------------------
# Smoke test
# ----------------------------------------------------------------------------
if __name__ == "__main__":
    key = jax.random.PRNGKey(0)
    kx, kx2, kp = jax.random.split(key, 3)
    params = init_params(kp)
    _, _, use_mxu_fc2 = _tpu_config()

    # Small batch (single-tile path).
    B = 8
    x = jax.random.normal(kx, (B, D_IN), jnp.float32)
    out = jax.block_until_ready(fc_base_forward(x, params))
    assert out.shape == (B,)

    ref_matched = reference_forward_matched(x, params, use_mxu_fc2)
    assert jnp.allclose(out, ref_matched, atol=1e-4, rtol=1e-4), (out, ref_matched)

    ref_f32 = reference_forward_f32(x, params)
    assert jnp.allclose(out, ref_f32, atol=5e-2, rtol=5e-2), (out, ref_f32)

    # Medium batch: exercises the two-tile (megacore) path with batch padding.
    B2 = 70
    x2 = jax.random.normal(kx2, (B2, D_IN), jnp.float32)
    out2 = jax.block_until_ready(fc_base_forward(x2, params))
    assert out2.shape == (B2,)
    ref2 = reference_forward_matched(x2, params, use_mxu_fc2)
    assert jnp.allclose(out2, ref2, atol=1e-4, rtol=1e-4), (out2, ref2)

    print("KERNEL_OK")
</pallas_src>

<mosaic_0001>
module attributes {stable_mosaic.version = 11 : i64} {
  func.func @fc_base_kernel(%arg0: i32, %arg1: memref<8x32xbf16, #tpu.memory_space<vmem>>, %arg2: memref<32x1024xbf16, #tpu.memory_space<vmem>>, %arg3: memref<1x1024xf32, #tpu.memory_space<vmem>>, %arg4: memref<1x1024xf32, #tpu.memory_space<vmem>>, %arg5: memref<1x1024xf32, #tpu.memory_space<vmem>>, %arg6: memref<1024x512xbf16, #tpu.memory_space<vmem>>, %arg7: memref<1x512xf32, #tpu.memory_space<vmem>>, %arg8: memref<1x512xf32, #tpu.memory_space<vmem>>, %arg9: memref<1x512xf32, #tpu.memory_space<vmem>>, %arg10: memref<512x1xbf16, #tpu.memory_space<vmem>>, %arg11: memref<1x1xf32, #tpu.memory_space<vmem>>, %arg12: memref<8x1xf32, #tpu.memory_space<vmem>>) attributes {dimension_semantics = [#tpu.dimension_semantics<parallel>], iteration_bounds = array<i64: 1>, scalar_prefetch = 0 : i64, scratch_operands = 0 : i64, tpu.core_type = #tpu.core_type<tc>, window_params = [{transform_indices = @transform_0, window_bounds = array<i64: 8, 32>}, {pipeline_mode = #tpu.pipeline_mode<synchronous>, transform_indices = @transform_1, window_bounds = array<i64: 32, 1024>}, {pipeline_mode = #tpu.pipeline_mode<synchronous>, transform_indices = @transform_2, window_bounds = array<i64: 1, 1024>}, {pipeline_mode = #tpu.pipeline_mode<synchronous>, transform_indices = @transform_3, window_bounds = array<i64: 1, 1024>}, {pipeline_mode = #tpu.pipeline_mode<synchronous>, transform_indices = @transform_4, window_bounds = array<i64: 1, 1024>}, {pipeline_mode = #tpu.pipeline_mode<synchronous>, transform_indices = @transform_5, window_bounds = array<i64: 1024, 512>}, {pipeline_mode = #tpu.pipeline_mode<synchronous>, transform_indices = @transform_6, window_bounds = array<i64: 1, 512>}, {pipeline_mode = #tpu.pipeline_mode<synchronous>, transform_indices = @transform_7, window_bounds = array<i64: 1, 512>}, {pipeline_mode = #tpu.pipeline_mode<synchronous>, transform_indices = @transform_8, window_bounds = array<i64: 1, 512>}, {pipeline_mode = #tpu.pipeline_mode<synchronous>, transform_indices = @transform_9, window_bounds = array<i64: 512, 1>}, {pipeline_mode = #tpu.pipeline_mode<synchronous>, transform_indices = @transform_10, window_bounds = array<i64: 1, 1>}, {transform_indices = @transform_11, window_bounds = array<i64: 8, 1>}]} {
    %c0 = arith.constant 0 : index
    %c0_0 = arith.constant 0 : index
    %0 = vector.load %arg3[%c0, %c0_0] : memref<1x1024xf32, #tpu.memory_space<vmem>>, vector<1x1024xf32>
    %c0_1 = arith.constant 0 : index
    %c0_2 = arith.constant 0 : index
    %1 = vector.load %arg4[%c0_1, %c0_2] : memref<1x1024xf32, #tpu.memory_space<vmem>>, vector<1x1024xf32>
    %c0_3 = arith.constant 0 : index
    %c0_4 = arith.constant 0 : index
    %2 = vector.load %arg5[%c0_3, %c0_4] : memref<1x1024xf32, #tpu.memory_space<vmem>>, vector<1x1024xf32>
    %c0_5 = arith.constant 0 : index
    %c0_6 = arith.constant 0 : index
    %3 = vector.load %arg7[%c0_5, %c0_6] : memref<1x512xf32, #tpu.memory_space<vmem>>, vector<1x512xf32>
    %c0_7 = arith.constant 0 : index
    %c0_8 = arith.constant 0 : index
    %4 = vector.load %arg8[%c0_7, %c0_8] : memref<1x512xf32, #tpu.memory_space<vmem>>, vector<1x512xf32>
    %c0_9 = arith.constant 0 : index
    %c0_10 = arith.constant 0 : index
    %5 = vector.load %arg9[%c0_9, %c0_10] : memref<1x512xf32, #tpu.memory_space<vmem>>, vector<1x512xf32>
    %c0_11 = arith.constant 0 : index
    %c0_12 = arith.constant 0 : index
    %6 = vector.load %arg11[%c0_11, %c0_12] : memref<1x1xf32, #tpu.memory_space<vmem>>, vector<1x1xf32>
    %c0_13 = arith.constant 0 : index
    %c0_14 = arith.constant 0 : index
    %7 = vector.load %arg1[%c0_13, %c0_14] : memref<8x32xbf16, #tpu.memory_space<vmem>>, vector<8x32xbf16>
    %c0_15 = arith.constant 0 : index
    %c0_16 = arith.constant 0 : index
    %8 = vector.load %arg2[%c0_15, %c0_16] : memref<32x1024xbf16, #tpu.memory_space<vmem>>, vector<32x1024xbf16>
    %cst = arith.constant dense<0.000000e+00> : vector<8x1024xf32>
    %9 = tpu.matmul %7, %8, %cst {dimension_numbers = #tpu.dot_dimension_numbers<[1], [0], [0], [1], [0, 0, 1, 1], [], []>} : vector<8x32xbf16>, vector<32x1024xbf16>, vector<8x1024xf32> -> vector<8x1024xf32>
    %10 = vector.broadcast %0 : vector<1x1024xf32> to vector<8x1024xf32>
    %11 = arith.addf %9, %10 : vector<8x1024xf32>
    %cst_17 = arith.constant dense<0.000000e+00> : vector<8xf32>
    %12 = vector.multi_reduction <add>, %11, %cst_17 [1] : vector<8x1024xf32> to vector<8xf32>
    %13 = vector.shape_cast %12 : vector<8xf32> to vector<8x1xf32>
    %14 = arith.mulf %11, %11 : vector<8x1024xf32>
    %cst_18 = arith.constant dense<0.000000e+00> : vector<8xf32>
    %15 = vector.multi_reduction <add>, %14, %cst_18 [1] : vector<8x1024xf32> to vector<8xf32>
    %16 = vector.shape_cast %15 : vector<8xf32> to vector<8x1xf32>
    %cst_19 = arith.constant 9.765625E-4 : f32
    %17 = vector.broadcast %cst_19 : f32 to vector<8x1xf32>
    %18 = arith.mulf %13, %17 : vector<8x1xf32>
    %cst_20 = arith.constant 9.765625E-4 : f32
    %19 = vector.broadcast %cst_20 : f32 to vector<8x1xf32>
    %20 = arith.mulf %16, %19 : vector<8x1xf32>
    %21 = arith.mulf %18, %18 : vector<8x1xf32>
    %22 = arith.subf %20, %21 : vector<8x1xf32>
    %cst_21 = arith.constant 0.000000e+00 : f32
    %23 = vector.broadcast %cst_21 : f32 to vector<8x1xf32>
    %24 = arith.maximumf %22, %23 : vector<8x1xf32>
    %25 = vector.broadcast %18 : vector<8x1xf32> to vector<8x1024xf32>
    %26 = arith.subf %11, %25 : vector<8x1024xf32>
    %cst_22 = arith.constant 9.99999974E-6 : f32
    %27 = vector.broadcast %cst_22 : f32 to vector<8x1xf32>
    %28 = arith.addf %24, %27 : vector<8x1xf32>
    %29 = math.rsqrt %28 : vector<8x1xf32>
    %30 = vector.broadcast %29 : vector<8x1xf32> to vector<8x1024xf32>
    %31 = arith.mulf %26, %30 : vector<8x1024xf32>
    %32 = vector.broadcast %1 : vector<1x1024xf32> to vector<8x1024xf32>
    %33 = arith.mulf %31, %32 : vector<8x1024xf32>
    %34 = vector.broadcast %2 : vector<1x1024xf32> to vector<8x1024xf32>
    %35 = arith.addf %33, %34 : vector<8x1024xf32>
    %cst_23 = arith.constant 0.000000e+00 : f32
    %36 = vector.broadcast %cst_23 : f32 to vector<8x1024xf32>
    %37 = arith.maximumf %35, %36 : vector<8x1024xf32>
    %38 = arith.truncf %37 : vector<8x1024xf32> to vector<8x1024xbf16>
    %c0_24 = arith.constant 0 : index
    %c0_25 = arith.constant 0 : index
    %39 = vector.load %arg6[%c0_24, %c0_25] : memref<1024x512xbf16, #tpu.memory_space<vmem>>, vector<1024x512xbf16>
    %cst_26 = arith.constant dense<0.000000e+00> : vector<8x512xf32>
    %40 = tpu.matmul %38, %39, %cst_26 {dimension_numbers = #tpu.dot_dimension_numbers<[1], [0], [0], [1], [0, 0, 1, 1], [], []>} : vector<8x1024xbf16>, vector<1024x512xbf16>, vector<8x512xf32> -> vector<8x512xf32>
    %41 = vector.broadcast %3 : vector<1x512xf32> to vector<8x512xf32>
    %42 = arith.addf %40, %41 : vector<8x512xf32>
    %cst_27 = arith.constant dense<0.000000e+00> : vector<8xf32>
    %43 = vector.multi_reduction <add>, %42, %cst_27 [1] : vector<8x512xf32> to vector<8xf32>
    %44 = vector.shape_cast %43 : vector<8xf32> to vector<8x1xf32>
    %45 = arith.mulf %42, %42 : vector<8x512xf32>
    %cst_28 = arith.constant dense<0.000000e+00> : vector<8xf32>
    %46 = vector.multi_reduction <add>, %45, %cst_28 [1] : vector<8x512xf32> to vector<8xf32>
    %47 = vector.shape_cast %46 : vector<8xf32> to vector<8x1xf32>
    %cst_29 = arith.constant 0.001953125 : f32
    %48 = vector.broadcast %cst_29 : f32 to vector<8x1xf32>
    %49 = arith.mulf %44, %48 : vector<8x1xf32>
    %cst_30 = arith.constant 0.001953125 : f32
    %50 = vector.broadcast %cst_30 : f32 to vector<8x1xf32>
    %51 = arith.mulf %47, %50 : vector<8x1xf32>
    %52 = arith.mulf %49, %49 : vector<8x1xf32>
    %53 = arith.subf %51, %52 : vector<8x1xf32>
    %cst_31 = arith.constant 0.000000e+00 : f32
    %54 = vector.broadcast %cst_31 : f32 to vector<8x1xf32>
    %55 = arith.maximumf %53, %54 : vector<8x1xf32>
    %56 = vector.broadcast %49 : vector<8x1xf32> to vector<8x512xf32>
    %57 = arith.subf %42, %56 : vector<8x512xf32>
    %cst_32 = arith.constant 9.99999974E-6 : f32
    %58 = vector.broadcast %cst_32 : f32 to vector<8x1xf32>
    %59 = arith.addf %55, %58 : vector<8x1xf32>
    %60 = math.rsqrt %59 : vector<8x1xf32>
    %61 = vector.broadcast %60 : vector<8x1xf32> to vector<8x512xf32>
    %62 = arith.mulf %57, %61 : vector<8x512xf32>
    %63 = vector.broadcast %4 : vector<1x512xf32> to vector<8x512xf32>
    %64 = arith.mulf %62, %63 : vector<8x512xf32>
    %65 = vector.broadcast %5 : vector<1x512xf32> to vector<8x512xf32>
    %66 = arith.addf %64, %65 : vector<8x512xf32>
    %cst_33 = arith.constant 0.000000e+00 : f32
    %67 = vector.broadcast %cst_33 : f32 to vector<8x512xf32>
    %68 = arith.maximumf %66, %67 : vector<8x512xf32>
    %69 = arith.truncf %68 : vector<8x512xf32> to vector<8x512xbf16>
    %c0_34 = arith.constant 0 : index
    %c0_35 = arith.constant 0 : index
    %70 = vector.load %arg10[%c0_34, %c0_35] : memref<512x1xbf16, #tpu.memory_space<vmem>>, vector<512x1xbf16>
    %cst_36 = arith.constant dense<0.000000e+00> : vector<8x1xf32>
    %71 = tpu.matmul %69, %70, %cst_36 {dimension_numbers = #tpu.dot_dimension_numbers<[1], [0], [0], [1], [0, 0, 1, 1], [], []>} : vector<8x512xbf16>, vector<512x1xbf16>, vector<8x1xf32> -> vector<8x1xf32>
    %72 = vector.broadcast %6 : vector<1x1xf32> to vector<8x1xf32>
    %73 = arith.addf %71, %72 : vector<8x1xf32>
    %c0_37 = arith.constant 0 : index
    %c0_38 = arith.constant 0 : index
    %74 = vector.load %arg12[%c0_37, %c0_38] : memref<8x1xf32, #tpu.memory_space<vmem>>, vector<8x1xf32>
    tpu.vector_store %arg12[%c0_37, %c0_38], %73 {strides = array<i32>} : memref<8x1xf32, #tpu.memory_space<vmem>>, vector<8x1xf32>,
    return
  }
  func.func @transform_0(%arg0: i32) -> (i32, i32) {
    %c0_i32 = arith.constant 0 : i32
    %c0_i32_0 = arith.constant 0 : i32
    return %arg0, %c0_i32 : i32, i32
  }
  func.func @transform_1(%arg0: i32) -> (i32, i32) {
    %c0_i32 = arith.constant 0 : i32
    %c0_i32_0 = arith.constant 0 : i32
    %c0_i32_1 = arith.constant 0 : i32
    return %c0_i32, %c0_i32_0 : i32, i32
  }
  func.func @transform_2(%arg0: i32) -> (i32, i32) {
    %c0_i32 = arith.constant 0 : i32
    %c0_i32_0 = arith.constant 0 : i32
    %c0_i32_1 = arith.constant 0 : i32
    return %c0_i32, %c0_i32_0 : i32, i32
  }
  func.func @transform_3(%arg0: i32) -> (i32, i32) {
    %c0_i32 = arith.constant 0 : i32
    %c0_i32_0 = arith.constant 0 : i32
    %c0_i32_1 = arith.constant 0 : i32
    return %c0_i32, %c0_i32_0 : i32, i32
  }
  func.func @transform_4(%arg0: i32) -> (i32, i32) {
    %c0_i32 = arith.constant 0 : i32
    %c0_i32_0 = arith.constant 0 : i32
    %c0_i32_1 = arith.constant 0 : i32
    return %c0_i32, %c0_i32_0 : i32, i32
  }
  func.func @transform_5(%arg0: i32) -> (i32, i32) {
    %c0_i32 = arith.constant 0 : i32
    %c0_i32_0 = arith.constant 0 : i32
    %c0_i32_1 = arith.constant 0 : i32
    return %c0_i32, %c0_i32_0 : i32, i32
  }
  func.func @transform_6(%arg0: i32) -> (i32, i32) {
    %c0_i32 = arith.constant 0 : i32
    %c0_i32_0 = arith.constant 0 : i32
    %c0_i32_1 = arith.constant 0 : i32
    return %c0_i32, %c0_i32_0 : i32, i32
  }
  func.func @transform_7(%arg0: i32) -> (i32, i32) {
    %c0_i32 = arith.constant 0 : i32
    %c0_i32_0 = arith.constant 0 : i32
    %c0_i32_1 = arith.constant 0 : i32
    return %c0_i32, %c0_i32_0 : i32, i32
  }
  func.func @transform_8(%arg0: i32) -> (i32, i32) {
    %c0_i32 = arith.constant 0 : i32
    %c0_i32_0 = arith.constant 0 : i32
    %c0_i32_1 = arith.constant 0 : i32
    return %c0_i32, %c0_i32_0 : i32, i32
  }
  func.func @transform_9(%arg0: i32) -> (i32, i32) {
    %c0_i32 = arith.constant 0 : i32
    %c0_i32_0 = arith.constant 0 : i32
    %c0_i32_1 = arith.constant 0 : i32
    return %c0_i32, %c0_i32_0 : i32, i32
  }
  func.func @transform_10(%arg0: i32) -> (i32, i32) {
    %c0_i32 = arith.constant 0 : i32
    %c0_i32_0 = arith.constant 0 : i32
    %c0_i32_1 = arith.constant 0 : i32
    return %c0_i32, %c0_i32_0 : i32, i32
  }
  func.func @transform_11(%arg0: i32) -> (i32, i32) {
    %c0_i32 = arith.constant 0 : i32
    %c0_i32_0 = arith.constant 0 : i32
    return %arg0, %c0_i32 : i32, i32
  }
}

</mosaic_0001>

<bundles_post_ra>
// kernel: tpu_custom_call.1
= control target key start
LH: loop header
LB: loop body
LE: loop exit
PB: predicated region body
PF: predicated region fallthrough
CT: control target
= control target key end

     0   :  { %s4786_s0 = inlined_call_operand.vmem [shape: bf16[8,32], index: 0, kind: input, shape index: {}]   ;;  %s4787_s1 = inlined_call_operand.vmem [shape: bf16[32,1024], index: 1, kind: input, shape index: {}]   ;;  %s4788_s2 = inlined_call_operand.vmem [shape: f32[1,1024], index: 2, kind: input, shape index: {}]   ;;  %s4789_s3 = inlined_call_operand.vmem [shape: f32[1,1024], index: 3, kind: input, shape index: {}]   ;;  %s4790_s4 = inlined_call_operand.vmem [shape: f32[1,1024], index: 4, kind: input, shape index: {}]   ;;  %s4791_s5 = inlined_call_operand.hbm [shape: bf16[1024,512], index: 5, kind: input, shape index: {}]   ;;  %s4792_s6 = inlined_call_operand.vmem [shape: f32[1,512], index: 6, kind: input, shape index: {}]   ;;  %s4793_s7 = inlined_call_operand.vmem [shape: f32[1,512], index: 7, kind: input, shape index: {}]   ;;  %s4794_s8 = inlined_call_operand.vmem [shape: f32[1,512], index: 8, kind: input, shape index: {}]   ;;  %s4795_s9 = inlined_call_operand.vmem [shape: bf16[512,1], index: 9, kind: input, shape index: {}]   ;;  %s4796_s10 = inlined_call_operand.<no memory space> [shape: f32[1,1], index: 10, kind: input, shape index: {}]   ;;  %s4797_s11 = inlined_call_operand.vmem [shape: f32[8,1], index: 11, kind: output, shape index: {}]  }
   0x1   :  { %v16_v0 = vstv %s4796_s10 }
   0x2   :  { %17 = vst [vmem:[#allocation2] sm:$0x1] %v16_v0 }
   0x3   :  { %18 = vsyncpa [#allocation4], 0  ;;  %s33_s21 = sshll.u32 %s4791_s5, 4  ;;  %s4323_s22 = smov [#allocation3]   ;;  %s34_s21 = int_to_ptr.hbm [resolvable:$true] %s33_s21 }
   0x4   :  { %s35_s23 = sshll.u32 %s4323_s22, 4  ;;  %s4324_s24 = smov 256   ;;  %s36_s23 = int_to_ptr.vmem [resolvable:$true] %s35_s23 }
   0x5   :  { %s4325_s25 = smov 16  }
   0x6   :  { %41 = dma.hbm_to_vmem [thread:$0]  %s34_s21, 32768, %s36_s23, [#allocation4], %s4324_s24, %s4324_s24, %s4325_s25  }
   0x7   :  { %4321 = dma.done.wait [#allocation4], 32768  }
   0x8   :  { %4322 = vsyncadd [#allocation4], 4294934528  ;;  %vm178_vm0 = vcmask 261120   ;;  %v2795_v1 = vld [vmem:[%s4787_s1 + $0x40] sm:$0xf]  ;;  %vm2754_vm7 = vcmask 7168  }
   0x9   :  { %v3997_v2 = vld [vmem:[%s4787_s1 + $0x5c] sm:$0xf0]  ;;  %v3993_v3 = vld [vmem:[%s4787_s1 + $0x44] sm:$0xf]  ;;  %v2803_v6 = vld [vmem:[%s4787_s1 + $0x48] sm:$0xf] }
   0xa   :  { %v2796_v4 = vor.u32 %v3997_v2, %v2795_v1  ;;  %v2797_v5 = vld [vmem:[%s4787_s1 + $0x60] sm:$0xf0]  ;;  %v3998_v7 = vld [vmem:[%s4787_s1 + $0x64] sm:$0xf0]  ;;  %v3994_v10 = vld [vmem:[%s4787_s1 + $0x4c] sm:$0xf] }
   0xb   :  { %v2800_v8 = vor.u32 %v3993_v3, %v2797_v5  ;;  %v2804_v9 = vor.u32 %v3998_v7, %v2803_v6  ;;  %v2805_v11 = vld [vmem:[%s4787_s1 + $0x68] sm:$0xf0]  ;;  %v2763_v12 = vld [vmem:[%s4787_s1] sm:$0xf]  ;;  %v3985_v15 = vld [vmem:[%s4787_s1 + $0x4] sm:$0xf] }
   0xc   :  { %188 = vmatpush.bf16.msra.mxu0 %v2796_v4  ;;  %v2808_v13 = vor.u32 %v3994_v10, %v2805_v11  ;;  %v3989_v14 = vld [vmem:[%s4787_s1 + $0x1c] sm:$0xf0]  ;;  %v2765_v16 = vld [vmem:[%s4787_s1 + $0x20] sm:$0xf0]  ;;  %v2771_v19 = vld [vmem:[%s4787_s1 + $0x8] sm:$0xf] }
   0xd   :  { %201 = vmatpush.bf16.msra.mxu1 %v2800_v8  ;;  %214 = vmatpush.bf16.msra.mxu2 %v2804_v9  ;;  %v2764_v17 = vor.u32 %v3989_v14, %v2763_v12  ;;  %v2768_v18 = vor.u32 %v3985_v15, %v2765_v16  ;;  %v3990_v20 = vld [vmem:[%s4787_s1 + $0x24] sm:$0xf0]  ;;  %v3986_v21 = vld [vmem:[%s4787_s1 + $0xc] sm:$0xf]  ;;  %v64_v24 = vld [vmem:[%s4786_s0] sm:$0xf] }
   0xe   :  { %227 = vmatpush.bf16.msra.mxu3 %v2808_v13  ;;  %v2772_v22 = vor.u32 %v3990_v20, %v2771_v19  ;;  %v2773_v23 = vld [vmem:[%s4787_s1 + $0x28] sm:$0xf0]  ;;  %v2811_v25 = vld [vmem:[%s4787_s1 + $0x50] sm:$0xf]  ;;  %v3995_v28 = vld [vmem:[%s4787_s1 + $0x54] sm:$0xf] }
   0xf   :  { %v2776_v26 = vor.u32 %v3986_v21, %v2773_v23  ;;  %v3999_v27 = vld [vmem:[%s4787_s1 + $0x6c] sm:$0xf0]  ;;  %v2813_v29 = vld [vmem:[%s4787_s1 + $0x70] sm:$0xf0]  ;;  %v2819_v32 = vld [vmem:[%s4787_s1 + $0x58] sm:$0xf] }
  0x10   :  { %189 = vmatpush.bf16.msra.mxu0 %v2764_v17  ;;  %v2812_v30 = vor.u32 %v3999_v27, %v2811_v25  ;;  %v2816_v31 = vor.u32 %v3995_v28, %v2813_v29  ;;  %v4000_v33 = vld [vmem:[%s4787_s1 + $0x74] sm:$0xf0]  ;;  %v3996_v34 = vld [vmem:[%s4787_s1 + $0x5c] sm:$0xf]  ;;  %v2779_v37 = vld [vmem:[%s4787_s1 + $0x10] sm:$0xf] }
  0x11   :  { %202 = vmatpush.bf16.msra.mxu1 %v2768_v18  ;;  %215 = vmatpush.bf16.msra.mxu2 %v2772_v22  ;;  %v2820_v35 = vor.u32 %v4000_v33, %v2819_v32  ;;  %v2821_v36 = vld [vmem:[%s4787_s1 + $0x78] sm:$0xf0]  ;;  %v3991_v38 = vld [vmem:[%s4787_s1 + $0x2c] sm:$0xf0]  ;;  %v3987_v41 = vld [vmem:[%s4787_s1 + $0x14] sm:$0xf] }
  0x12   :  { %228 = vmatpush.bf16.msra.mxu3 %v2776_v26  ;;  %v2824_v39 = vor.u32 %v3996_v34, %v2821_v36  ;;  %v2780_v40 = vor.u32 %v3991_v38, %v2779_v37  ;;  %v2781_v42 = vld [vmem:[%s4787_s1 + $0x30] sm:$0xf0]  ;;  %v2787_v43 = vld [vmem:[%s4787_s1 + $0x18] sm:$0xf]  ;;  %v3988_v46 = vld [vmem:[%s4787_s1 + $0x1c] sm:$0xf] }
  0x13   :  { %2825 = vmatmul.msk.bf16.vlgmr.msra.gmra.mxu0 %vm178_vm0, %v64_v24  ;;  %v2784_v44 = vor.u32 %v3987_v41, %v2781_v42  ;;  %v3992_v45 = vld [vmem:[%s4787_s1 + $0x34] sm:$0xf0]  ;;  %v2789_v47 = vld [vmem:[%s4787_s1 + $0x38] sm:$0xf0]  ;;  %v4502_v51 = vld [vmem:[%s4788_s2] sm:$0xff] }
  0x14   :  { %240 = vmatpush.bf16.msrb.mxu0 %v2812_v30  ;;  %2826 = vmatmul.msk.bf16.vlgmr.msra.gmra.mxu1 %vm178_vm0, %v64_v24  ;;  %v2788_v48 = vor.u32 %v3992_v45, %v2787_v43  ;;  %v2792_v49 = vor.u32 %v3988_v46, %v2789_v47  ;;  %v82_v53 = vperm.slane %v4502_v51, 0  ;;  %v83_v54 = vperm.slane %v4502_v51, 1  ;;  %v2947_v58 = vld [vmem:[#allocation3 + $0xe0] sm:$0xf]  ;;  %v4031_v59 = vld [vmem:[#allocation3 + $0xec] sm:$0xf0] }
  0x15   :  { %253 = vmatpush.bf16.msrb.mxu1 %v2816_v31  ;;  %2827 = vmatmul.msk.bf16.vlgmr.msra.gmra.mxu2 %vm178_vm0, %v64_v24  ;;  %v84_v55 = vperm.slane %v4502_v51, 2  ;;  %v85_v56 = vperm.slane %v4502_v51, 3  ;;  %v86_v57 = vperm.slane %v4502_v51, 4  ;;  %v3075_v60 = vld [vmem:[#allocation3 + $0x1e0] sm:$0xf]  ;;  %v2948_v62 = vor.u32 %v4031_v59, %v2947_v58 }
  0x16   :  { %2828 = vmatmul.msk.bf16.vlgmr.msra.gmra.mxu3 %vm178_vm0, %v64_v24  ;;  %266 = vmatpush.bf16.msrb.mxu2 %v2820_v35  ;;  %v4063_v63 = vld [vmem:[#allocation3 + $0x1ec] sm:$0xf0]  ;;  %v3203_v0 = vld [vmem:[#allocation3 + $0x2e0] sm:$0xf] }
  0x17   :  { %279 = vmatpush.bf16.msrb.mxu3 %v2824_v39  ;;  %v4095_v1 = vld [vmem:[#allocation3 + $0x2ec] sm:$0xf0]  ;;  %v3076_v6 = vor.u32 %v4063_v63, %v3075_v60  ;;  %v3331_v8 = vld [vmem:[#allocation3 + $0x3e0] sm:$0xf] }
  0x18   :  { %241 = vmatpush.bf16.msrb.mxu0 %v2780_v40  ;;  %v3204_v7 = vor.u32 %v4095_v1, %v3203_v0  ;;  %v4127_v9 = vld [vmem:[#allocation3 + $0x3ec] sm:$0xf0]  ;;  %v2931_v10 = vld [vmem:[#allocation3 + $0xc0] sm:$0xf]  ;;  %v88_v0 = vperm.slane %v4502_v51, 6 }
  0x19   :  { %254 = vmatpush.bf16.msrb.mxu1 %v2784_v44  ;;  %v3332_v12 = vor.u32 %v4127_v9, %v3331_v8  ;;  %v4027_v13 = vld [vmem:[#allocation3 + $0xcc] sm:$0xf0]  ;;  %v3059_v14 = vld [vmem:[#allocation3 + $0x1c0] sm:$0xf] }
  0x1a   :  { %267 = vmatpush.bf16.msrb.mxu2 %v2788_v48  ;;  %v4059_v15 = vld [vmem:[#allocation3 + $0x1cc] sm:$0xf0]  ;;  %v2932_v17 = vor.u32 %v4027_v13, %v2931_v10  ;;  %v3187_v18 = vld [vmem:[#allocation3 + $0x2c0] sm:$0xf] }
  0x1b   :  { %280 = vmatpush.bf16.msrb.mxu3 %v2792_v49  ;;  %v4091_v19 = vld [vmem:[#allocation3 + $0x2cc] sm:$0xf0]  ;;  %v3315_v20 = vld [vmem:[#allocation3 + $0x3c0] sm:$0xf]  ;;  %v3060_v21 = vor.u32 %v4059_v15, %v3059_v14 }
  0x1c   :  { %1955 = vmatpush.bf16.msra.mxu0 %v2948_v62  ;;  %v3188_v22 = vor.u32 %v4091_v19, %v3187_v18  ;;  %v4123_v23 = vld [vmem:[#allocation3 + $0x3cc] sm:$0xf0]  ;;  %v3043_v28 = vld [vmem:[#allocation3 + $0x1a0] sm:$0xf] }
  0x1d   :  { %1968 = vmatpush.bf16.msra.mxu1 %v3076_v6  ;;  %v4023_v25 = vld [vmem:[#allocation3 + $0xac] sm:$0xf0]  ;;  %v3316_v27 = vor.u32 %v4123_v23, %v3315_v20  ;;  %v3171_v30 = vld [vmem:[#allocation3 + $0x2a0] sm:$0xf] }
  0x1e   :  { %1981 = vmatpush.bf16.msra.mxu2 %v3204_v7  ;;  %v4055_v29 = vld [vmem:[#allocation3 + $0x1ac] sm:$0xf0]  ;;  %v3299_v36 = vld [vmem:[#allocation3 + $0x3a0] sm:$0xf]  ;;  %v89_v7 = vperm.slane %v4502_v51, 7 }
  0x1f   :  { %1994 = vmatpush.bf16.msra.mxu3 %v3332_v12  ;;  %v4087_v35 = vld [vmem:[#allocation3 + $0x2ac] sm:$0xf0]  ;;  %v3044_v39 = vor.u32 %v4055_v29, %v3043_v28  ;;  %v2899_v41 = vld [vmem:[#allocation3 + $0x80] sm:$0xf] }
  0x20   :  { %1956 = vmatpush.bf16.msra.mxu0 %v2932_v17  ;;  %v4119_v37 = vld [vmem:[#allocation3 + $0x3ac] sm:$0xf0]  ;;  %v3172_v40 = vor.u32 %v4087_v35, %v3171_v30  ;;  %v3027_v43 = vld [vmem:[#allocation3 + $0x180] sm:$0xf] }
  0x21   :  { %1969 = vmatpush.bf16.msra.mxu1 %v3060_v21  ;;  %v4019_v42 = vld [vmem:[#allocation3 + $0x8c] sm:$0xf0]  ;;  %v3300_v45 = vor.u32 %v4119_v37, %v3299_v36  ;;  %v3155_v47 = vld [vmem:[#allocation3 + $0x280] sm:$0xf] }
  0x22   :  { %1982 = vmatpush.bf16.msra.mxu2 %v3188_v22  ;;  %v4051_v46 = vld [vmem:[#allocation3 + $0x18c] sm:$0xf0]  ;;  %v2900_v60 = vor.u32 %v4019_v42, %v2899_v41  ;;  %v2883_v28 = vld [vmem:[#allocation3 + $0x60] sm:$0xf] }
  0x23   :  { %2829 = vmatmul.msk.bf16.vlgmr.msrb.gmra.mxu0 %vm178_vm0, %v64_v24  ;;  %1995 = vmatpush.bf16.msra.mxu3 %v3316_v27  ;;  %v4083_v48 = vld [vmem:[#allocation3 + $0x28c] sm:$0xf0]  ;;  %v3028_v62 = vor.u32 %v4051_v46, %v3027_v43  ;;  %v3011_v30 = vld [vmem:[#allocation3 + $0x160] sm:$0xf] }
  0x24   :  { %2830 = vmatmul.msk.bf16.vlgmr.msrb.gmra.mxu1 %vm178_vm0, %v64_v24  ;;  %v3156_v63 = vor.u32 %v4083_v48, %v3155_v47  ;;  %v4015_v29 = vld [vmem:[#allocation3 + $0x6c] sm:$0xf0]  ;;  %v2995_v43 = vld [vmem:[#allocation3 + $0x140] sm:$0xf] }
  0x25   :  { %2831 = vmatmul.msk.bf16.vlgmr.msrb.gmra.mxu2 %vm178_vm0, %v64_v24  ;;  %1970 = vmatpush.bf16.msra.mxu1 %v3044_v39  ;;  %v4079_v35 = vld [vmem:[#allocation3 + $0x26c] sm:$0xf0]  ;;  %v3123_v47 = vld [vmem:[#allocation3 + $0x240] sm:$0xf] }
  0x26   :  { %2832 = vmatmul.msk.bf16.vlgmr.msrb.gmra.mxu3 %vm178_vm0, %v64_v24  ;;  %v2915_v24 = vld [vmem:[#allocation3 + $0xa0] sm:$0xf]  ;;  %1983 = vmatpush.bf16.msra.mxu2 %v3172_v40  ;;  %v4111_v39 = vld [vmem:[#allocation3 + $0x36c] sm:$0xf0] }
  0x27   :  { %v2916_v34 = vor.u32 %v4023_v25, %v2915_v24  ;;  %1996 = vmatpush.bf16.msra.mxu3 %v3300_v45  ;;  %v2867_v40 = vld [vmem:[#allocation3 + $0x40] sm:$0xf]  ;;  %v4011_v42 = vld [vmem:[#allocation3 + $0x4c] sm:$0xf0] }
  0x28   :  { %v2868_v45 = vor.u32 %v4011_v42, %v2867_v40  ;;  %v4075_v48 = vld [vmem:[#allocation3 + $0x24c] sm:$0xf0] }
  0x29   :  { %1957 = vmatpush.bf16.msra.mxu0 %v2916_v34  ;;  %1971 = vmatpush.bf16.msra.mxu1 %v3028_v62  ;;  %v3139_v34 = vld [vmem:[#allocation3 + $0x260] sm:$0xf]  ;;  %v4071_v62 = vld [vmem:[#allocation3 + $0x22c] sm:$0xf0] }
  0x2a   :  { %1984 = vmatpush.bf16.msra.mxu2 %v3156_v63  ;;  %v3140_v37 = vor.u32 %v4079_v35, %v3139_v34  ;;  %v4219_v40 = vld [vmem:[#allocation3 + $0x6cc] sm:$0xf0] }
  0x2b   :  { %v4251_v42 = vld [vmem:[#allocation3 + $0x7cc] sm:$0xf0] }
  0x2d   :  { %1958 = vmatpush.bf16.msra.mxu0 %v2900_v60  ;;  %v4039_v60 = vld [vmem:[#allocation3 + $0x12c] sm:$0xf0] }
  0x2e   :  { %1985 = vmatpush.bf16.msra.mxu2 %v3140_v37  ;;  %v4187_v37 = vld [vmem:[#allocation3 + $0x5cc] sm:$0xf0] }
  0x90   :  { %v191_v50 = vpop.f32.mrf.mxu0 }
  0x91   :  { %v204_v52 = vpop.f32.mrf.mxu1  ;;  %v4509_v2 = vadd.f32 %v191_v50, %v82_v53  ;;  %v87_v53 = vperm.slane %v4502_v51, 5 }
  0x92   :  { %v4511_v3 = vadd.f32 %v204_v52, %v83_v54  ;;  %v3283_v54 = vld [vmem:[#allocation3 + $0x380] sm:$0xf] }
  0x93   :  { %v295_v31 = vmul.f32 %v4509_v2, %v4509_v2 }
  0x94   :  { %v286_v26 = vadd.f32 %v4511_v3, %v4509_v2  ;;  %v296_v32 = vmul.f32 %v4511_v3, %v4511_v3 }
  0x98   :  { %v217_v61 = vpop.f32.mrf.mxu2  ;;  %v193_v5 = vpop.f32.mrf.mxu0 }
  0x99   :  { %v230_v4 = vpop.f32.mrf.mxu3  ;;  %v206_v11 = vpop.f32.mrf.mxu1  ;;  %v4513_v16 = vadd.f32 %v217_v61, %v84_v55  ;;  %v4115_v55 = vld [vmem:[#allocation3 + $0x38c] sm:$0xf0] }
  0x9a   :  { %v4521_v33 = vadd.f32 %v230_v4, %v85_v56  ;;  %v303_v56 = vadd.f32 %v296_v32, %v295_v31  ;;  %v3284_v1 = vor.u32 %v4115_v55, %v3283_v54  ;;  %v2884_v31 = vor.u32 %v4015_v29, %v2883_v28  ;;  %v4047_v32 = vld [vmem:[#allocation3 + $0x16c] sm:$0xf0]  ;;  %v2851_v54 = vld [vmem:[#allocation3 + $0x20] sm:$0xf] }
  0x9b   :  { %v287_v38 = vadd.f32 %v286_v26, %v4513_v16  ;;  %v297_v49 = vmul.f32 %v4513_v16, %v4513_v16  ;;  %v3012_v36 = vor.u32 %v4047_v32, %v3011_v30  ;;  %v4007_v55 = vld [vmem:[#allocation3 + $0x2c] sm:$0xf0]  ;;  %v3843_v28 = vld [vmem:[#allocation3 + $0x7e0] sm:$0xf] }
  0x9c   :  { %v298_v5 = vmul.f32 %v4521_v33, %v4521_v33  ;;  %1997 = vmatpush.bf16.msra.mxu3 %v3284_v1  ;;  %1959 = vmatpush.bf16.msra.mxu0 %v2884_v31  ;;  %v3235_v1 = vld [vmem:[#allocation3 + $0x320] sm:$0xf]  ;;  %v4255_v30 = vld [vmem:[#allocation3 + $0x7ec] sm:$0xf0] }
  0x9d   :  { %v288_v61 = vadd.f32 %v287_v38, %v4521_v33  ;;  %v304_v4 = vadd.f32 %v303_v56, %v297_v49  ;;  %v3267_v38 = vld [vmem:[#allocation3 + $0x360] sm:$0xf]  ;;  %1972 = vmatpush.bf16.msra.mxu1 %v3012_v36  ;;  %v4155_v32 = vld [vmem:[#allocation3 + $0x4cc] sm:$0xf0]  ;;  %v3844_v34 = vor.u32 %v4255_v30, %v3843_v28 }
  0x9e   :  { %v3268_v41 = vor.u32 %v4111_v39, %v3267_v38  ;;  %v3251_v49 = vld [vmem:[#allocation3 + $0x340] sm:$0xf]  ;;  %v4171_v30 = vld [vmem:[#allocation3 + $0x54c] sm:$0xf0] }
  0x9f   :  { %v305_v10 = vadd.f32 %v304_v4, %v298_v5  ;;  %v2979_v56 = vld [vmem:[#allocation3 + $0x120] sm:$0xf]  ;;  %v4103_v4 = vld [vmem:[#allocation3 + $0x32c] sm:$0xf0] }
  0xa0   :  { %v219_v44 = vpop.f32.mrf.mxu2  ;;  %v243_v52 = vpop.f32.mrf.mxu0  ;;  %1998 = vmatpush.bf16.msra.mxu3 %v3268_v41  ;;  %1960 = vmatpush.bf16.msra.mxu0 %v2868_v45  ;;  %v2980_v63 = vor.u32 %v4039_v60, %v2979_v56  ;;  %v3236_v5 = vor.u32 %v4103_v4, %v3235_v1  ;;  %v3443_v31 = vld [vmem:[#allocation3 + $0x4c0] sm:$0xf]  ;;  %v4247_v56 = vld [vmem:[#allocation3 + $0x7ac] sm:$0xf0] }
  0xa1   :  { %v232_v50 = vpop.f32.mrf.mxu3  ;;  %v4529_v58 = vadd.f32 %v243_v52, %v86_v57  ;;  %v256_v59 = vpop.f32.mrf.mxu1  ;;  %v4043_v44 = vld [vmem:[#allocation3 + $0x14c] sm:$0xf0]  ;;  %v3444_v35 = vor.u32 %v4155_v32, %v3443_v31  ;;  %v3571_v36 = vld [vmem:[#allocation3 + $0x5c0] sm:$0xf] }
  0xa2   :  { %v4536_v6 = vadd.f32 %v256_v59, %v87_v53  ;;  %v2996_v46 = vor.u32 %v4043_v44, %v2995_v43  ;;  %v3124_v50 = vor.u32 %v4075_v48, %v3123_v47  ;;  %v4107_v52 = vld [vmem:[#allocation3 + $0x34c] sm:$0xf0]  ;;  %v2852_v59 = vor.u32 %v4007_v55, %v2851_v54  ;;  %v3699_v38 = vld [vmem:[#allocation3 + $0x6c0] sm:$0xf] }
  0xa3   :  { %v289_v57 = vadd.f32 %v288_v61, %v4529_v58  ;;  %v299_v8 = vmul.f32 %v4529_v58, %v4529_v58  ;;  %v3252_v53 = vor.u32 %v4107_v52, %v3251_v49  ;;  %v3107_v61 = vld [vmem:[#allocation3 + $0x220] sm:$0xf]  ;;  %v3572_v39 = vor.u32 %v4187_v37, %v3571_v36  ;;  %v4183_v49 = vld [vmem:[#allocation3 + $0x5ac] sm:$0xf0] }
  0xa4   :  { %v300_v51 = vmul.f32 %v4536_v6, %v4536_v6  ;;  %1973 = vmatpush.bf16.msra.mxu1 %v2996_v46  ;;  %1986 = vmatpush.bf16.msra.mxu2 %v3124_v50  ;;  %v3827_v41 = vld [vmem:[#allocation3 + $0x7c0] sm:$0xf]  ;;  %v3700_v43 = vor.u32 %v4219_v40, %v3699_v38  ;;  %v4151_v46 = vld [vmem:[#allocation3 + $0x4ac] sm:$0xf0] }
  0xa5   :  { %v290_v14 = vadd.f32 %v289_v57, %v4536_v6  ;;  %v306_v18 = vadd.f32 %v305_v10, %v299_v8  ;;  %1999 = vmatpush.bf16.msra.mxu3 %v3252_v53  ;;  %1961 = vmatpush.bf16.msra.mxu0 %v2852_v59  ;;  %v2835_v57 = vld [vmem:[#allocation3] sm:$0xf]  ;;  %v4035_v10 = vld [vmem:[#allocation3 + $0x10c] sm:$0xf0]  ;;  %v3828_v44 = vor.u32 %v4251_v42, %v3827_v41 }
  0xa6   :  { %v2963_v8 = vld [vmem:[#allocation3 + $0x100] sm:$0xf]  ;;  %v4215_v52 = vld [vmem:[#allocation3 + $0x6ac] sm:$0xf0] }
  0xa7   :  { %v307_v22 = vadd.f32 %v306_v18, %v300_v51  ;;  %v3219_v18 = vld [vmem:[#allocation3 + $0x300] sm:$0xf]  ;;  %v4099_v51 = vld [vmem:[#allocation3 + $0x30c] sm:$0xf0] }
  0xa8   :  { %v269_v9 = vpop.f32.mrf.mxu2  ;;  %v245_v13 = vpop.f32.mrf.mxu0  ;;  %1974 = vmatpush.bf16.msra.mxu1 %v2980_v63  ;;  %v3427_v45 = vld [vmem:[#allocation3 + $0x4a0] sm:$0xf]  ;;  %v4211_v4 = vld [vmem:[#allocation3 + $0x68c] sm:$0xf0] }
  0xa9   :  { %v4541_v11 = vadd.f32 %v269_v9, %v88_v0  ;;  %v282_v12 = vpop.f32.mrf.mxu3  ;;  %v258_v17 = vpop.f32.mrf.mxu1  ;;  %v3108_v0 = vor.u32 %v4071_v62, %v3107_v61  ;;  %2000 = vmatpush.bf16.msra.mxu3 %v3236_v5  ;;  %v4067_v13 = vld [vmem:[#allocation3 + $0x20c] sm:$0xf0]  ;;  %v3555_v47 = vld [vmem:[#allocation3 + $0x5a0] sm:$0xf]  ;;  %v3428_v48 = vor.u32 %v4151_v46, %v3427_v45 }
  0xaa   :  { %v4544_v15 = vadd.f32 %v282_v12, %v89_v7  ;;  %v4003_v7 = vld [vmem:[#allocation3 + $0xc] sm:$0xf0]  ;;  %v3091_v12 = vld [vmem:[#allocation3 + $0x200] sm:$0xf]  ;;  %v3556_v53 = vor.u32 %v4183_v49, %v3555_v47 }
  0xab   :  { %v291_v19 = vadd.f32 %v290_v14, %v4541_v11  ;;  %v301_v20 = vmul.f32 %v4541_v11, %v4541_v11  ;;  %1987 = vmatpush.bf16.msra.mxu2 %v3108_v0  ;;  %v2836_v9 = vor.u32 %v4003_v7, %v2835_v57  ;;  %v2964_v14 = vor.u32 %v4035_v10, %v2963_v8  ;;  %v3683_v50 = vld [vmem:[#allocation3 + $0x6a0] sm:$0xf]  ;;  %v4147_v61 = vld [vmem:[#allocation3 + $0x48c] sm:$0xf0] }
  0xac   :  { %v302_v25 = vmul.f32 %v4544_v15, %v4544_v15  ;;  %v3092_v17 = vor.u32 %v4067_v13, %v3091_v12  ;;  %v3684_v54 = vor.u32 %v4215_v52, %v3683_v50  ;;  %v3811_v55 = vld [vmem:[#allocation3 + $0x7a0] sm:$0xf]  ;;  %v4179_v0 = vld [vmem:[#allocation3 + $0x58c] sm:$0xf0] }
  0xad   :  { %v292_v21 = vadd.f32 %v291_v19, %v4544_v15  ;;  %v308_v26 = vadd.f32 %v307_v22, %v301_v20  ;;  %v3459_v19 = vld [vmem:[#allocation3 + $0x4e0] sm:$0xf]  ;;  %1962 = vmatpush.bf16.msra.mxu0 %v2836_v9  ;;  %v3220_v20 = vor.u32 %v4099_v51, %v3219_v18  ;;  %1975 = vmatpush.bf16.msra.mxu1 %v2964_v14  ;;  %v4243_v8 = vld [vmem:[#allocation3 + $0x78c] sm:$0xf0] }
  0xae   :  { %v3587_v22 = vld [vmem:[#allocation3 + $0x5e0] sm:$0xf]  ;;  %v3812_v59 = vor.u32 %v4247_v56, %v3811_v55  ;;  %v4143_v12 = vld [vmem:[#allocation3 + $0x46c] sm:$0xf0] }
  0xaf   :  { %293 = vadd.xlane.f32.xlu0 %v292_v21  ;;  %v309_v27 = vadd.f32 %v308_v26, %v302_v25  ;;  %v4159_v21 = vld [vmem:[#allocation3 + $0x4ec] sm:$0xf0]  ;;  %1988 = vmatpush.bf16.msra.mxu2 %v3092_v17  ;;  %v3715_v26 = vld [vmem:[#allocation3 + $0x6e0] sm:$0xf] }
  0xb0   :  { %v271_v23 = vpop.f32.mrf.mxu2  ;;  %2001 = vmatpush.bf16.msra.mxu3 %v3220_v20  ;;  %v3411_v60 = vld [vmem:[#allocation3 + $0x480] sm:$0xf]  ;;  %v4175_v17 = vld [vmem:[#allocation3 + $0x56c] sm:$0xf0] }
  0xb1   :  { %v284_v24 = vpop.f32.mrf.mxu3  ;;  %v4191_v23 = vld [vmem:[#allocation3 + $0x5ec] sm:$0xf0]  ;;  %v3539_v62 = vld [vmem:[#allocation3 + $0x580] sm:$0xf]  ;;  %v3412_v63 = vor.u32 %v4147_v61, %v3411_v60 }
  0xb2   :  { %v3460_v24 = vor.u32 %v4159_v21, %v3459_v19  ;;  %v3588_v25 = vor.u32 %v4191_v23, %v3587_v22  ;;  %v3667_v1 = vld [vmem:[#allocation3 + $0x680] sm:$0xf]  ;;  %v3540_v5 = vor.u32 %v4179_v0, %v3539_v62  ;;  %v4207_v51 = vld [vmem:[#allocation3 + $0x66c] sm:$0xf0] }
  0xb3   :  { %v3668_v57 = vor.u32 %v4211_v4, %v3667_v1  ;;  %v3795_v7 = vld [vmem:[#allocation3 + $0x780] sm:$0xf]  ;;  %v4239_v23 = vld [vmem:[#allocation3 + $0x76c] sm:$0xf0] }
  0xb4   :  { %2007 = vmatpush.bf16.msrb.mxu0 %v3460_v24  ;;  %2020 = vmatpush.bf16.msrb.mxu1 %v3588_v25  ;;  %v3796_v9 = vor.u32 %v4243_v8, %v3795_v7  ;;  %v3395_v10 = vld [vmem:[#allocation3 + $0x460] sm:$0xf]  ;;  %v4203_v32 = vld [vmem:[#allocation3 + $0x64c] sm:$0xf0] }
  0xb5   :  { %2046 = vmatpush.bf16.msrb.mxu3 %v3844_v34  ;;  %v3523_v13 = vld [vmem:[#allocation3 + $0x560] sm:$0xf]  ;;  %v3396_v14 = vor.u32 %v4143_v12, %v3395_v10  ;;  %v4235_v37 = vld [vmem:[#allocation3 + $0x74c] sm:$0xf0] }
  0xb6   :  { %v3651_v18 = vld [vmem:[#allocation3 + $0x660] sm:$0xf]  ;;  %v3524_v20 = vor.u32 %v4175_v17, %v3523_v13  ;;  %v4135_v40 = vld [vmem:[#allocation3 + $0x42c] sm:$0xf0] }
  0xb7   :  { %310 = vadd.xlane.f32.xlu0 %v309_v27  ;;  %v4223_v27 = vld [vmem:[#allocation3 + $0x6ec] sm:$0xf0]  ;;  %v3652_v21 = vor.u32 %v4207_v51, %v3651_v18  ;;  %v3779_v22 = vld [vmem:[#allocation3 + $0x760] sm:$0xf] }
  0xb8   :  { %v3716_v29 = vor.u32 %v4223_v27, %v3715_v26  ;;  %2008 = vmatpush.bf16.msrb.mxu0 %v3444_v35  ;;  %2021 = vmatpush.bf16.msrb.mxu1 %v3572_v39  ;;  %v3780_v25 = vor.u32 %v4239_v23, %v3779_v22  ;;  %v3379_v26 = vld [vmem:[#allocation3 + $0x440] sm:$0xf]  ;;  %v4139_v27 = vld [vmem:[#allocation3 + $0x44c] sm:$0xf0] }
  0xb9   :  { %2047 = vmatpush.bf16.msrb.mxu3 %v3828_v44  ;;  %v3507_v28 = vld [vmem:[#allocation3 + $0x540] sm:$0xf]  ;;  %v4167_v42 = vld [vmem:[#allocation3 + $0x52c] sm:$0xf0] }
  0xba   :  { %2033 = vmatpush.bf16.msrb.mxu2 %v3716_v29  ;;  %v3380_v29 = vor.u32 %v4139_v27, %v3379_v26  ;;  %v3635_v31 = vld [vmem:[#allocation3 + $0x640] sm:$0xf]  ;;  %v3508_v34 = vor.u32 %v4171_v30, %v3507_v28  ;;  %v4199_v44 = vld [vmem:[#allocation3 + $0x62c] sm:$0xf0] }
  0xbb   :  { %v3636_v35 = vor.u32 %v4203_v32, %v3635_v31  ;;  %v3763_v36 = vld [vmem:[#allocation3 + $0x740] sm:$0xf]  ;;  %v4163_v55 = vld [vmem:[#allocation3 + $0x50c] sm:$0xf0] }
  0xbc   :  { %2009 = vmatpush.bf16.msrb.mxu0 %v3428_v48  ;;  %2022 = vmatpush.bf16.msrb.mxu1 %v3556_v53  ;;  %v3363_v38 = vld [vmem:[#allocation3 + $0x420] sm:$0xf]  ;;  %v3764_v39 = vor.u32 %v4235_v37, %v3763_v36  ;;  %v4231_v48 = vld [vmem:[#allocation3 + $0x72c] sm:$0xf0]  ;;  %v2949_v36 = vld [vmem:[#allocation3 + $0xf0] sm:$0xf0] }
  0xbd   :  { %2048 = vmatpush.bf16.msrb.mxu3 %v3812_v59  ;;  %v3491_v41 = vld [vmem:[#allocation3 + $0x520] sm:$0xf]  ;;  %v3364_v46 = vor.u32 %v4135_v40, %v3363_v38  ;;  %v4131_v53 = vld [vmem:[#allocation3 + $0x40c] sm:$0xf0]  ;;  %v4061_v37 = vld [vmem:[#allocation3 + $0x1e4] sm:$0xf] }
  0xbe   :  { %2034 = vmatpush.bf16.msrb.mxu2 %v3700_v43  ;;  %v3619_v43 = vld [vmem:[#allocation3 + $0x620] sm:$0xf]  ;;  %v3492_v47 = vor.u32 %v4167_v42, %v3491_v41  ;;  %v4195_v62 = vld [vmem:[#allocation3 + $0x60c] sm:$0xf0]  ;;  %v3077_v42 = vld [vmem:[#allocation3 + $0x1f0] sm:$0xf0] }
  0xbf   :  { %v3747_v45 = vld [vmem:[#allocation3 + $0x720] sm:$0xf]  ;;  %v3620_v52 = vor.u32 %v4199_v44, %v3619_v43  ;;  %v4227_v0 = vld [vmem:[#allocation3 + $0x70c] sm:$0xf0]  ;;  %v4093_v43 = vld [vmem:[#allocation3 + $0x2e4] sm:$0xf] }
  0xc0   :  { %2010 = vmatpush.bf16.msrb.mxu0 %v3412_v63  ;;  %2023 = vmatpush.bf16.msrb.mxu1 %v3540_v5  ;;  %v3347_v49 = vld [vmem:[#allocation3 + $0x400] sm:$0xf]  ;;  %v3748_v60 = vor.u32 %v4231_v48, %v3747_v45  ;;  %v3205_v44 = vld [vmem:[#allocation3 + $0x2f0] sm:$0xf0] }
  0xc1   :  { %2049 = vmatpush.bf16.msrb.mxu3 %v3796_v9  ;;  %v3603_v61 = vld [vmem:[#allocation3 + $0x600] sm:$0xf]  ;;  %v3348_v4 = vor.u32 %v4131_v53, %v3347_v49 }
  0xc2   :  { %2035 = vmatpush.bf16.msrb.mxu2 %v3684_v54  ;;  %v3475_v54 = vld [vmem:[#allocation3 + $0x500] sm:$0xf] }
  0xc3   :  { %v3731_v63 = vld [vmem:[#allocation3 + $0x700] sm:$0xf]  ;;  %v3476_v5 = vor.u32 %v4163_v55, %v3475_v54  ;;  %v4125_v54 = vld [vmem:[#allocation3 + $0x3e4] sm:$0xf]  ;;  %v3333_v55 = vld [vmem:[#allocation3 + $0x3f0] sm:$0xf0] }
  0xc4   :  { %2011 = vmatpush.bf16.msrb.mxu0 %v3396_v14  ;;  %2024 = vmatpush.bf16.msrb.mxu1 %v3524_v20  ;;  %v3732_v8 = vor.u32 %v4227_v0, %v3731_v63  ;;  %v4561_v17 = vld [vmem:[%s4789_s3] sm:$0xff] }
  0xc5   :  { %2050 = vmatpush.bf16.msrb.mxu3 %v3780_v25  ;;  %v4566_v51 = vld [vmem:[%s4790_s4] sm:$0xff]  ;;  %v345_v23 = vperm.slane %v4561_v17, 0  ;;  %v346_v27 = vperm.slane %v4561_v17, 1  ;;  %v348_v28 = vperm.slane %v4561_v17, 3 }
  0xc6   :  { %2036 = vmatpush.bf16.msrb.mxu2 %v3668_v57  ;;  %v3604_v57 = vor.u32 %v4195_v62, %v3603_v61  ;;  %v370_v26 = vperm.slane %v4566_v51, 0  ;;  %v373_v30 = vperm.slane %v4566_v51, 3  ;;  %v4025_v0 = vld [vmem:[#allocation3 + $0xc4] sm:$0xf] }
  0xc8   :  { %2012 = vmatpush.bf16.msrb.mxu0 %v3380_v29  ;;  %2025 = vmatpush.bf16.msrb.mxu1 %v3508_v34  ;;  %v371_v29 = vperm.slane %v4566_v51, 1 }
  0xc9   :  { %2051 = vmatpush.bf16.msrb.mxu3 %v3764_v39 }
  0xca   :  { %2037 = vmatpush.bf16.msrb.mxu2 %v3652_v21 }
  0xcc   :  { %2013 = vmatpush.bf16.msrb.mxu0 %v3364_v46  ;;  %2026 = vmatpush.bf16.msrb.mxu1 %v3492_v47 }
  0xcd   :  { %2052 = vmatpush.bf16.msrb.mxu3 %v3748_v60  ;;  %v3208_v60 = vor.u32 %v4093_v43, %v3205_v44  ;;  %v4017_v43 = vld [vmem:[#allocation3 + $0x84] sm:$0xf]  ;;  %v2901_v44 = vld [vmem:[#allocation3 + $0x90] sm:$0xf0] }
  0xce   :  { %2038 = vmatpush.bf16.msrb.mxu2 %v3636_v35  ;;  %v4029_v35 = vld [vmem:[#allocation3 + $0xe4] sm:$0xf] }
  0xd0   :  { %2014 = vmatpush.bf16.msrb.mxu0 %v3348_v4  ;;  %2027 = vmatpush.bf16.msrb.mxu1 %v3476_v5  ;;  %v4057_v4 = vld [vmem:[#allocation3 + $0x1c4] sm:$0xf]  ;;  %v350_v5 = vperm.slane %v4561_v17, 5 }
  0xd1   :  { %2053 = vmatpush.bf16.msrb.mxu3 %v3732_v8 }
  0xd2   :  { %2039 = vmatpush.bf16.msrb.mxu2 %v3620_v52 }
  0xd6   :  { %2040 = vmatpush.bf16.msrb.mxu2 %v3604_v57 }
 0x122   :  { %v294_v19 = vpop.xlane.xlu0 %293 }
 0x123   :  { %v4554_v24 = vmul.f32 0.0009765625, %v294_v19 }
 0x125   :  { %v314_v56 = vmul.f32 %v4554_v24, %v4554_v24  ;;  %v317_v19 = vsub.f32 %v4509_v2, %v4554_v24  ;;  %v318_v20 = vsub.f32 %v4511_v3, %v4554_v24  ;;  %v319_v21 = vsub.f32 %v4513_v16, %v4554_v24 }
 0x126   :  { %v320_v25 = vsub.f32 %v4521_v33, %v4554_v24  ;;  %v347_v2 = vperm.slane %v4561_v17, 2  ;;  %v372_v16 = vperm.slane %v4566_v51, 2  ;;  %v321_v45 = vsub.f32 %v4529_v58, %v4554_v24 }
 0x127   :  { %v322_v46 = vsub.f32 %v4536_v6, %v4554_v24  ;;  %v323_v47 = vsub.f32 %v4541_v11, %v4554_v24  ;;  %v324_v48 = vsub.f32 %v4544_v15, %v4554_v24  ;;  %v349_v58 = vperm.slane %v4561_v17, 4 }
 0x128   :  { %v3336_v11 = vor.u32 %v4125_v54, %v3333_v55  ;;  %v4113_v54 = vld [vmem:[#allocation3 + $0x384] sm:$0xf]  ;;  %v3285_v55 = vld [vmem:[#allocation3 + $0x390] sm:$0xf0] }
 0x12a   :  { %v311_v50 = vpop.xlane.xlu0 %310 }
 0x12b   :  { %v313_v59 = vmul.f32 0.0009765625, %v311_v50 }
 0x12d   :  { %v315_v1 = vsub.f32 %v313_v59, %v314_v56  ;;  %v2952_v56 = vor.u32 %v4029_v35, %v2949_v36  ;;  %v3080_v59 = vor.u32 %v4061_v37, %v3077_v42  ;;  %v376_v35 = vperm.slane %v4566_v51, 6 }
 0x12e   :  { %v377_v37 = vperm.slane %v4566_v51, 7 }
 0x12f   :  { %v316_v7 = vmax.f32 %v315_v1, 0.0  ;;  %v2933_v1 = vld [vmem:[#allocation3 + $0xd0] sm:$0xf0] }
 0x131   :  { %v325_v9 = vadd.f32 1e-05, %v316_v7 }
 0x133   :  { %4293 = vrsqrt.f32 %v325_v9  ;;  %vm332_vm2 = vweird.f32 %v325_v9 }
 0x139   :  { %v4294_v10 = vpop.eup %4293 }
 0x13a   :  { %v327_v12 = vmul.f32 %v4294_v10, %v325_v9  ;;  %vm333_vm1 = vweird.f32 %v4294_v10 }
 0x13b   :  { %vm334_vm3 = vmor %vm332_vm2, %vm333_vm1 }
 0x13c   :  { %v328_v13 = vmul.f32 %v4294_v10, %v327_v12  ;;  %v4089_v12 = vld [vmem:[#allocation3 + $0x2c4] sm:$0xf] }
 0x13e   :  { %v329_v14 = vmul.f32 0.5, %v328_v13  ;;  %v3189_v13 = vld [vmem:[#allocation3 + $0x2d0] sm:$0xf0] }
 0x140   :  { %v330_v18 = vsub.f32 1.5, %v329_v14  ;;  %v4121_v14 = vld [vmem:[#allocation3 + $0x3c4] sm:$0xf] }
 0x142   :  { %v331_v22 = vmul.f32 %v4294_v10, %v330_v18  ;;  %v3317_v18 = vld [vmem:[#allocation3 + $0x3d0] sm:$0xf0] }
 0x144   :  { %v335_v3 = vsel %vm334_vm3, %v4294_v10, %v331_v22  ;;  %v3061_v10 = vld [vmem:[#allocation3 + $0x1d0] sm:$0xf0]  ;;  %v352_v22 = vperm.slane %v4561_v17, 7 }
 0x145   :  { %v336_v31 = vmul.f32 %v335_v3, %v317_v19  ;;  %v337_v32 = vmul.f32 %v335_v3, %v318_v20  ;;  %v338_v34 = vmul.f32 %v335_v3, %v319_v21  ;;  %v339_v33 = vmul.f32 %v335_v3, %v320_v25 }
 0x146   :  { %v340_v15 = vmul.f32 %v335_v3, %v321_v45  ;;  %v341_v24 = vmul.f32 %v335_v3, %v322_v46  ;;  %v342_v19 = vmul.f32 %v335_v3, %v323_v47  ;;  %v351_v20 = vperm.slane %v4561_v17, 6  ;;  %v2917_v17 = vld [vmem:[#allocation3 + $0xb0] sm:$0xf0] }
 0x147   :  { %v361_v38 = vmul.f32 %v345_v23, %v336_v31  ;;  %v362_v39 = vmul.f32 %v346_v27, %v337_v32  ;;  %v363_v40 = vmul.f32 %v347_v2, %v338_v34  ;;  %v364_v41 = vmul.f32 %v348_v28, %v339_v33  ;;  %v4021_v2 = vld [vmem:[#allocation3 + $0xa4] sm:$0xf]  ;;  %v3173_v34 = vld [vmem:[#allocation3 + $0x2b0] sm:$0xf0] }
 0x148   :  { %v343_v21 = vmul.f32 %v335_v3, %v324_v48  ;;  %v374_v23 = vperm.slane %v4566_v51, 4  ;;  %v2936_v25 = vor.u32 %v4025_v0, %v2933_v1  ;;  %v3192_v27 = vor.u32 %v4089_v12, %v3189_v13  ;;  %v4085_v32 = vld [vmem:[#allocation3 + $0x2a4] sm:$0xf] }
 0x149   :  { %v386_v49 = vadd.f32 %v370_v26, %v361_v38  ;;  %v387_v50 = vadd.f32 %v371_v29, %v362_v39  ;;  %v388_v52 = vadd.f32 %v372_v16, %v363_v40  ;;  %v389_v53 = vadd.f32 %v373_v30, %v364_v41  ;;  %v4053_v29 = vld [vmem:[#allocation3 + $0x1a4] sm:$0xf]  ;;  %v3045_v16 = vld [vmem:[#allocation3 + $0x1b0] sm:$0xf0] }
 0x14a   :  { %v3064_v26 = vor.u32 %v4057_v4, %v3061_v10  ;;  %v375_v28 = vperm.slane %v4566_v51, 5  ;;  %v3320_v3 = vor.u32 %v4121_v14, %v3317_v18  ;;  %v365_v30 = vmul.f32 %v349_v58, %v340_v15  ;;  %v4117_v38 = vld [vmem:[#allocation3 + $0x3a4] sm:$0xf]  ;;  %v3301_v39 = vld [vmem:[#allocation3 + $0x3b0] sm:$0xf0] }
 0x14b   :  { %v394_v61 = vmax.f32 %v386_v49, 0.0  ;;  %v395_v62 = vmax.f32 %v387_v50, 0.0  ;;  %v396_v6 = vmax.f32 %v388_v52, 0.0  ;;  %v397_v63 = vmax.f32 %v389_v53, 0.0  ;;  %v4049_v48 = vld [vmem:[#allocation3 + $0x184] sm:$0xf] }
 0x14c   :  { %v366_v31 = vmul.f32 %v350_v5, %v341_v24  ;;  %v367_v33 = vmul.f32 %v351_v20, %v342_v19  ;;  %v368_v36 = vmul.f32 %v352_v22, %v343_v21  ;;  %v2920_v40 = vor.u32 %v4021_v2, %v2917_v17  ;;  %v3029_v49 = vld [vmem:[#allocation3 + $0x190] sm:$0xf0]  ;;  %v4081_v50 = vld [vmem:[#allocation3 + $0x284] sm:$0xf] }
 0x14d   :  { %v4594_v57 = vpack.c.bf16 %v394_v61, %v394_v61  ;;  %v4596_v7 = vpack.c.bf16 %v395_v62, %v395_v62  ;;  %v4598_v8 = vpack.c.bf16 %v396_v6, %v396_v6  ;;  %v4600_v9 = vpack.c.bf16 %v397_v63, %v397_v63  ;;  %v3157_v51 = vld [vmem:[#allocation3 + $0x290] sm:$0xf0]  ;;  %v4045_v6 = vld [vmem:[#allocation3 + $0x164] sm:$0xf] }
 0x14e   :  { %v3048_v41 = vor.u32 %v4053_v29, %v3045_v16  ;;  %v3176_v42 = vor.u32 %v4085_v32, %v3173_v34  ;;  %v390_v45 = vadd.f32 %v374_v23, %v365_v30  ;;  %v391_v46 = vadd.f32 %v375_v28, %v366_v31  ;;  %v3013_v63 = vld [vmem:[#allocation3 + $0x170] sm:$0xf0]  ;;  %v4077_v15 = vld [vmem:[#allocation3 + $0x264] sm:$0xf] }
 0x14f   :  { %1963 = vmatmul.bf16.vlgmr.msra.gmra.mxu0 %v4594_v57  ;;  %1976 = vmatmul.bf16.vlgmr.msra.gmra.mxu1 %v4596_v7  ;;  %v3304_v47 = vor.u32 %v4117_v38, %v3301_v39  ;;  %v392_v52 = vadd.f32 %v376_v35, %v367_v33  ;;  %v393_v53 = vadd.f32 %v377_v37, %v368_v36  ;;  %v3141_v24 = vld [vmem:[#allocation3 + $0x270] sm:$0xf0]  ;;  %v4109_v5 = vld [vmem:[#allocation3 + $0x364] sm:$0xf] }
 0x150   :  { %1989 = vmatmul.bf16.vlgmr.msra.gmra.mxu2 %v4598_v8  ;;  %2002 = vmatmul.bf16.vlgmr.msra.gmra.mxu3 %v4600_v9  ;;  %v3032_v58 = vor.u32 %v4049_v48, %v3029_v49  ;;  %v398_v61 = vmax.f32 %v390_v45, 0.0  ;;  %v399_v62 = vmax.f32 %v391_v46, 0.0  ;;  %v3160_v0 = vor.u32 %v4081_v50, %v3157_v51  ;;  %v3269_v10 = vld [vmem:[#allocation3 + $0x370] sm:$0xf0]  ;;  %v4009_v20 = vld [vmem:[#allocation3 + $0x44] sm:$0xf] }
 0x151   :  { %2059 = vmatpush.bf16.msra.mxu0 %v2952_v56  ;;  %2072 = vmatpush.bf16.msra.mxu1 %v3080_v59  ;;  %v4013_v56 = vld [vmem:[#allocation3 + $0x64] sm:$0xf]  ;;  %v2885_v59 = vld [vmem:[#allocation3 + $0x70] sm:$0xf0]  ;;  %v400_v1 = vmax.f32 %v392_v52, 0.0  ;;  %v401_v4 = vmax.f32 %v393_v53, 0.0  ;;  %v3016_v13 = vor.u32 %v4045_v6, %v3013_v63  ;;  %v3144_v19 = vor.u32 %v4077_v15, %v3141_v24 }
 0x152   :  { %2085 = vmatpush.bf16.msra.mxu2 %v3208_v60  ;;  %2098 = vmatpush.bf16.msra.mxu3 %v3336_v11  ;;  %v2904_v60 = vor.u32 %v4017_v43, %v2901_v44  ;;  %v3288_v11 = vor.u32 %v4113_v54, %v3285_v55  ;;  %v2888_v12 = vor.u32 %v4013_v56, %v2885_v59  ;;  %v2869_v21 = vld [vmem:[#allocation3 + $0x50] sm:$0xf0]  ;;  %v4073_v2 = vld [vmem:[#allocation3 + $0x244] sm:$0xf] }
 0x153   :  { %v4612_v14 = vpack.c.bf16 %v398_v61, %v398_v61  ;;  %v4614_v18 = vpack.c.bf16 %v399_v62, %v399_v62  ;;  %v4616_v22 = vpack.c.bf16 %v400_v1, %v400_v1  ;;  %v4618_v23 = vpack.c.bf16 %v401_v4, %v401_v4  ;;  %v3125_v28 = vld [vmem:[#allocation3 + $0x250] sm:$0xf0]  ;;  %v4005_v30 = vld [vmem:[#allocation3 + $0x24] sm:$0xf] }
 0x154   :  { %v3253_v17 = vld [vmem:[#allocation3 + $0x350] sm:$0xf0]  ;;  %v2872_v29 = vor.u32 %v4009_v20, %v2869_v21  ;;  %v3128_v32 = vor.u32 %v4073_v2, %v3125_v28  ;;  %v4037_v33 = vld [vmem:[#allocation3 + $0x124] sm:$0xf] }
 0x155   :  { %2060 = vmatpush.bf16.msra.mxu0 %v2936_v25  ;;  %2073 = vmatpush.bf16.msra.mxu1 %v3064_v26  ;;  %v3272_v25 = vor.u32 %v4109_v5, %v3269_v10  ;;  %v4041_v26 = vld [vmem:[#allocation3 + $0x144] sm:$0xf]  ;;  %v2853_v31 = vld [vmem:[#allocation3 + $0x30] sm:$0xf0] }
 0x156   :  { %2086 = vmatpush.bf16.msra.mxu2 %v3192_v27  ;;  %2099 = vmatpush.bf16.msra.mxu3 %v3320_v3  ;;  %v2997_v27 = vld [vmem:[#allocation3 + $0x150] sm:$0xf0]  ;;  %v4105_v3 = vld [vmem:[#allocation3 + $0x344] sm:$0xf] }
 0x157   :  { %v3000_v16 = vor.u32 %v4041_v26, %v2997_v27  ;;  %v3256_v34 = vor.u32 %v4105_v3, %v3253_v17  ;;  %v2981_v35 = vld [vmem:[#allocation3 + $0x130] sm:$0xf0]  ;;  %v4069_v36 = vld [vmem:[#allocation3 + $0x224] sm:$0xf] }
 0x158   :  { %v3109_v37 = vld [vmem:[#allocation3 + $0x230] sm:$0xf0]  ;;  %v4101_v38 = vld [vmem:[#allocation3 + $0x324] sm:$0xf] }
 0x159   :  { %2061 = vmatpush.bf16.msra.mxu0 %v2920_v40  ;;  %2074 = vmatpush.bf16.msra.mxu1 %v3048_v41  ;;  %v3237_v39 = vld [vmem:[#allocation3 + $0x330] sm:$0xf0]  ;;  %v4001_v40 = vld [vmem:[#allocation3 + $0x4] sm:$0xf]  ;;  %v2856_v41 = vor.u32 %v4005_v30, %v2853_v31  ;;  %v3112_v46 = vor.u32 %v4069_v36, %v3109_v37 }
 0x15a   :  { %2087 = vmatpush.bf16.msra.mxu2 %v3176_v42  ;;  %2100 = vmatpush.bf16.msra.mxu3 %v3304_v47  ;;  %v2984_v42 = vor.u32 %v4037_v33, %v2981_v35  ;;  %v2837_v43 = vld [vmem:[#allocation3 + $0x10] sm:$0xf0]  ;;  %v4033_v44 = vld [vmem:[#allocation3 + $0x104] sm:$0xf]  ;;  %v3240_v47 = vor.u32 %v4101_v38, %v3237_v39 }
 0x15b   :  { %v2965_v45 = vld [vmem:[#allocation3 + $0x110] sm:$0xf0]  ;;  %v4065_v48 = vld [vmem:[#allocation3 + $0x204] sm:$0xf]  ;;  %v2840_v59 = vor.u32 %v4001_v40, %v2837_v43 }
 0x15c   :  { %v3093_v49 = vld [vmem:[#allocation3 + $0x210] sm:$0xf0]  ;;  %v4097_v50 = vld [vmem:[#allocation3 + $0x304] sm:$0xf] }
 0x15d   :  { %2062 = vmatpush.bf16.msra.mxu0 %v2904_v60  ;;  %2075 = vmatpush.bf16.msra.mxu1 %v3032_v58  ;;  %v3221_v52 = vld [vmem:[#allocation3 + $0x310] sm:$0xf0]  ;;  %v4157_v53 = vld [vmem:[#allocation3 + $0x4e4] sm:$0xf]  ;;  %v2968_v60 = vor.u32 %v4033_v44, %v2965_v45  ;;  %v3096_v6 = vor.u32 %v4065_v48, %v3093_v49 }
 0x15e   :  { %2088 = vmatpush.bf16.msra.mxu2 %v3160_v0  ;;  %2101 = vmatpush.bf16.msra.mxu3 %v3288_v11  ;;  %v3461_v51 = vld [vmem:[#allocation3 + $0x4f0] sm:$0xf0]  ;;  %v4189_v54 = vld [vmem:[#allocation3 + $0x5e4] sm:$0xf]  ;;  %v3224_v63 = vor.u32 %v4097_v50, %v3221_v52 }
 0x15f   :  { %2015 = vmatmul.bf16.vlgmr.msrb.gmra.mxu0 %v4612_v14  ;;  %2028 = vmatmul.bf16.vlgmr.msrb.gmra.mxu1 %v4614_v18  ;;  %v3589_v55 = vld [vmem:[#allocation3 + $0x5f0] sm:$0xf0]  ;;  %v4221_v56 = vld [vmem:[#allocation3 + $0x6e4] sm:$0xf]  ;;  %v3464_v0 = vor.u32 %v4157_v53, %v3461_v51 }
 0x160   :  { %2041 = vmatmul.bf16.vlgmr.msrb.gmra.mxu2 %v4616_v22  ;;  %2054 = vmatmul.bf16.vlgmr.msrb.gmra.mxu3 %v4618_v23  ;;  %v3717_v58 = vld [vmem:[#allocation3 + $0x6f0] sm:$0xf0]  ;;  %v4253_v61 = vld [vmem:[#allocation3 + $0x7e4] sm:$0xf]  ;;  %v3592_v11 = vor.u32 %v4189_v54, %v3589_v55 }
 0x161   :  { %2063 = vmatpush.bf16.msra.mxu0 %v2888_v12  ;;  %2076 = vmatpush.bf16.msra.mxu1 %v3016_v13  ;;  %v3845_v62 = vld [vmem:[#allocation3 + $0x7f0] sm:$0xf0]  ;;  %v4153_v1 = vld [vmem:[#allocation3 + $0x4c4] sm:$0xf]  ;;  %v3720_v15 = vor.u32 %v4221_v56, %v3717_v58 }
 0x162   :  { %2089 = vmatpush.bf16.msra.mxu2 %v3144_v19  ;;  %2102 = vmatpush.bf16.msra.mxu3 %v3272_v25  ;;  %v3445_v4 = vld [vmem:[#allocation3 + $0x4d0] sm:$0xf0]  ;;  %v3848_v24 = vor.u32 %v4253_v61, %v3845_v62  ;;  %v4185_v5 = vld [vmem:[#allocation3 + $0x5c4] sm:$0xf] }
 0x163   :  { %v3573_v10 = vld [vmem:[#allocation3 + $0x5d0] sm:$0xf0]  ;;  %v4217_v12 = vld [vmem:[#allocation3 + $0x6c4] sm:$0xf]  ;;  %v3448_v21 = vor.u32 %v4153_v1, %v3445_v4 }
 0x164   :  { %v3701_v13 = vld [vmem:[#allocation3 + $0x6d0] sm:$0xf0]  ;;  %v4249_v19 = vld [vmem:[#allocation3 + $0x7c4] sm:$0xf]  ;;  %v3576_v25 = vor.u32 %v4185_v5, %v3573_v10 }
 0x165   :  { %2064 = vmatpush.bf16.msra.mxu0 %v2872_v29  ;;  %2077 = vmatpush.bf16.msra.mxu1 %v3000_v16  ;;  %v3829_v20 = vld [vmem:[#allocation3 + $0x7d0] sm:$0xf0]  ;;  %v4149_v26 = vld [vmem:[#allocation3 + $0x4a4] sm:$0xf]  ;;  %v3704_v2 = vor.u32 %v4217_v12, %v3701_v13 }
 0x166   :  { %2090 = vmatpush.bf16.msra.mxu2 %v3128_v32  ;;  %2103 = vmatpush.bf16.msra.mxu3 %v3256_v34  ;;  %v3429_v27 = vld [vmem:[#allocation3 + $0x4b0] sm:$0xf0]  ;;  %v3832_v28 = vor.u32 %v4249_v19, %v3829_v20  ;;  %v4181_v3 = vld [vmem:[#allocation3 + $0x5a4] sm:$0xf] }
 0x167   :  { %v3557_v17 = vld [vmem:[#allocation3 + $0x5b0] sm:$0xf0]  ;;  %v4213_v29 = vld [vmem:[#allocation3 + $0x6a4] sm:$0xf]  ;;  %v3432_v32 = vor.u32 %v4149_v26, %v3429_v27 }
 0x168   :  { %v3685_v16 = vld [vmem:[#allocation3 + $0x6b0] sm:$0xf0]  ;;  %v4245_v30 = vld [vmem:[#allocation3 + $0x7a4] sm:$0xf]  ;;  %v3560_v34 = vor.u32 %v4181_v3, %v3557_v17 }
 0x169   :  { %2065 = vmatpush.bf16.msra.mxu0 %v2856_v41  ;;  %2078 = vmatpush.bf16.msra.mxu1 %v2984_v42  ;;  %v3813_v31 = vld [vmem:[#allocation3 + $0x7b0] sm:$0xf0]  ;;  %v4145_v33 = vld [vmem:[#allocation3 + $0x484] sm:$0xf]  ;;  %v3688_v36 = vor.u32 %v4213_v29, %v3685_v16 }
 0x16a   :  { %2091 = vmatpush.bf16.msra.mxu2 %v3112_v46  ;;  %2104 = vmatpush.bf16.msra.mxu3 %v3240_v47  ;;  %v3413_v35 = vld [vmem:[#allocation3 + $0x490] sm:$0xf0]  ;;  %v3816_v37 = vor.u32 %v4245_v30, %v3813_v31  ;;  %v4177_v38 = vld [vmem:[#allocation3 + $0x584] sm:$0xf] }
 0x16b   :  { %v3541_v39 = vld [vmem:[#allocation3 + $0x590] sm:$0xf0]  ;;  %v4209_v40 = vld [vmem:[#allocation3 + $0x684] sm:$0xf]  ;;  %v3416_v44 = vor.u32 %v4145_v33, %v3413_v35 }
 0x16c   :  { %v3669_v41 = vld [vmem:[#allocation3 + $0x690] sm:$0xf0]  ;;  %v4241_v42 = vld [vmem:[#allocation3 + $0x784] sm:$0xf]  ;;  %v3544_v45 = vor.u32 %v4177_v38, %v3541_v39  ;;  %v3083_v38 = vld [vmem:[#allocation3 + $0x1e8] sm:$0xf] }
 0x16d   :  { %2066 = vmatpush.bf16.msra.mxu0 %v2840_v59  ;;  %2079 = vmatpush.bf16.msra.mxu1 %v2968_v60  ;;  %v3797_v43 = vld [vmem:[#allocation3 + $0x790] sm:$0xf0]  ;;  %v4141_v46 = vld [vmem:[#allocation3 + $0x464] sm:$0xf]  ;;  %v3672_v48 = vor.u32 %v4209_v40, %v3669_v41  ;;  %v4064_v39 = vld [vmem:[#allocation3 + $0x1f4] sm:$0xf0] }
 0x16e   :  { %2092 = vmatpush.bf16.msra.mxu2 %v3096_v6  ;;  %2105 = vmatpush.bf16.msra.mxu3 %v3224_v63  ;;  %v3397_v47 = vld [vmem:[#allocation3 + $0x470] sm:$0xf0]  ;;  %v3800_v49 = vor.u32 %v4241_v42, %v3797_v43  ;;  %v4173_v50 = vld [vmem:[#allocation3 + $0x564] sm:$0xf]  ;;  %v3211_v40 = vld [vmem:[#allocation3 + $0x2e8] sm:$0xf] }
 0x16f   :  { %v3525_v52 = vld [vmem:[#allocation3 + $0x570] sm:$0xf0]  ;;  %v4205_v53 = vld [vmem:[#allocation3 + $0x664] sm:$0xf]  ;;  %v3400_v56 = vor.u32 %v4141_v46, %v3397_v47  ;;  %v4096_v43 = vld [vmem:[#allocation3 + $0x2f4] sm:$0xf0] }
 0x170   :  { %2067 = vmatmul.bf16.vlgmr.msra.gmra.mxu0 %v4594_v57  ;;  %2080 = vmatmul.bf16.vlgmr.msra.gmra.mxu1 %v4596_v7  ;;  %v3653_v51 = vld [vmem:[#allocation3 + $0x670] sm:$0xf0]  ;;  %v4237_v54 = vld [vmem:[#allocation3 + $0x764] sm:$0xf]  ;;  %v3528_v59 = vor.u32 %v4173_v50, %v3525_v52  ;;  %v2939_v50 = vld [vmem:[#allocation3 + $0xc8] sm:$0xf] }
 0x171   :  { %2111 = vmatpush.bf16.msrb.mxu0 %v3464_v0  ;;  %2124 = vmatpush.bf16.msrb.mxu1 %v3592_v11  ;;  %v3781_v55 = vld [vmem:[#allocation3 + $0x770] sm:$0xf0]  ;;  %v4137_v60 = vld [vmem:[#allocation3 + $0x444] sm:$0xf]  ;;  %v3656_v61 = vor.u32 %v4205_v53, %v3653_v51  ;;  %v4028_v52 = vld [vmem:[#allocation3 + $0xd4] sm:$0xf0]  ;;  %v3212_v53 = vor.u32 %v4096_v43, %v3211_v40 }
 0x172   :  { %2137 = vmatpush.bf16.msrb.mxu2 %v3720_v15  ;;  %2150 = vmatpush.bf16.msrb.mxu3 %v3848_v24  ;;  %v3381_v58 = vld [vmem:[#allocation3 + $0x450] sm:$0xf0]  ;;  %v3784_v62 = vor.u32 %v4237_v54, %v3781_v55  ;;  %v4169_v6 = vld [vmem:[#allocation3 + $0x544] sm:$0xf]  ;;  %v3067_v54 = vld [vmem:[#allocation3 + $0x1c8] sm:$0xf] }
 0x173   :  { %2093 = vmatmul.bf16.vlgmr.msra.gmra.mxu2 %v4598_v8  ;;  %2106 = vmatmul.bf16.vlgmr.msra.gmra.mxu3 %v4600_v9  ;;  %v3509_v63 = vld [vmem:[#allocation3 + $0x550] sm:$0xf0]  ;;  %v4201_v0 = vld [vmem:[#allocation3 + $0x644] sm:$0xf]  ;;  %v3384_v15 = vor.u32 %v4137_v60, %v3381_v58  ;;  %v4060_v55 = vld [vmem:[#allocation3 + $0x1d4] sm:$0xf0] }
 0x174   :  { %v3637_v11 = vld [vmem:[#allocation3 + $0x650] sm:$0xf0]  ;;  %v4233_v1 = vld [vmem:[#allocation3 + $0x744] sm:$0xf]  ;;  %v3512_v24 = vor.u32 %v4169_v6, %v3509_v63  ;;  %v3323_v60 = vld [vmem:[#allocation3 + $0x3c8] sm:$0xf] }
 0x175   :  { %2112 = vmatpush.bf16.msrb.mxu0 %v3448_v21  ;;  %2125 = vmatpush.bf16.msrb.mxu1 %v3576_v25  ;;  %v3765_v4 = vld [vmem:[#allocation3 + $0x750] sm:$0xf0]  ;;  %v4133_v5 = vld [vmem:[#allocation3 + $0x424] sm:$0xf]  ;;  %v3640_v12 = vor.u32 %v4201_v0, %v3637_v11  ;;  %v4124_v58 = vld [vmem:[#allocation3 + $0x3d4] sm:$0xf0] }
 0x176   :  { %2138 = vmatpush.bf16.msrb.mxu2 %v3704_v2  ;;  %2151 = vmatpush.bf16.msrb.mxu3 %v3832_v28  ;;  %v3365_v10 = vld [vmem:[#allocation3 + $0x430] sm:$0xf0]  ;;  %v3768_v13 = vor.u32 %v4233_v1, %v3765_v4  ;;  %v4165_v19 = vld [vmem:[#allocation3 + $0x524] sm:$0xf]  ;;  %v2923_v6 = vld [vmem:[#allocation3 + $0xa8] sm:$0xf]  ;;  %v3324_v11 = vor.u32 %v4124_v58, %v3323_v60 }
 0x177   :  { %v3493_v20 = vld [vmem:[#allocation3 + $0x530] sm:$0xf0]  ;;  %v4197_v21 = vld [vmem:[#allocation3 + $0x624] sm:$0xf]  ;;  %v3368_v28 = vor.u32 %v4133_v5, %v3365_v10  ;;  %v4024_v63 = vld [vmem:[#allocation3 + $0xb4] sm:$0xf0] }
 0x178   :  { %v3621_v25 = vld [vmem:[#allocation3 + $0x630] sm:$0xf0]  ;;  %v4229_v26 = vld [vmem:[#allocation3 + $0x724] sm:$0xf]  ;;  %v3496_v3 = vor.u32 %v4165_v19, %v3493_v20  ;;  %v3051_v1 = vld [vmem:[#allocation3 + $0x1a8] sm:$0xf] }
 0x179   :  { %2113 = vmatpush.bf16.msrb.mxu0 %v3432_v32  ;;  %2126 = vmatpush.bf16.msrb.mxu1 %v3560_v34  ;;  %v3749_v27 = vld [vmem:[#allocation3 + $0x730] sm:$0xf0]  ;;  %v4129_v2 = vld [vmem:[#allocation3 + $0x404] sm:$0xf]  ;;  %v3624_v30 = vor.u32 %v4197_v21, %v3621_v25  ;;  %v4056_v4 = vld [vmem:[#allocation3 + $0x1b4] sm:$0xf0] }
 0x17a   :  { %2139 = vmatpush.bf16.msrb.mxu2 %v3688_v36  ;;  %2152 = vmatpush.bf16.msrb.mxu3 %v3816_v37  ;;  %v3349_v17 = vld [vmem:[#allocation3 + $0x410] sm:$0xf0]  ;;  %v4161_v29 = vld [vmem:[#allocation3 + $0x504] sm:$0xf]  ;;  %v3752_v31 = vor.u32 %v4229_v26, %v3749_v27  ;;  %v2955_v36 = vld [vmem:[#allocation3 + $0xe8] sm:$0xf] }
 0x17b   :  { %v3477_v16 = vld [vmem:[#allocation3 + $0x510] sm:$0xf0]  ;;  %v4193_v32 = vld [vmem:[#allocation3 + $0x604] sm:$0xf]  ;;  %v4032_v37 = vld [vmem:[#allocation3 + $0xf4] sm:$0xf0]  ;;  %v3352_v41 = vor.u32 %v4129_v2, %v3349_v17 }
 0x17c   :  { %v3605_v34 = vld [vmem:[#allocation3 + $0x610] sm:$0xf0]  ;;  %v4225_v33 = vld [vmem:[#allocation3 + $0x704] sm:$0xf]  ;;  %v3480_v42 = vor.u32 %v4161_v29, %v3477_v16  ;;  %v3307_v5 = vld [vmem:[#allocation3 + $0x3a8] sm:$0xf] }
 0x17d   :  { %2114 = vmatpush.bf16.msrb.mxu0 %v3416_v44  ;;  %2127 = vmatpush.bf16.msrb.mxu1 %v3544_v45  ;;  %v3733_v35 = vld [vmem:[#allocation3 + $0x710] sm:$0xf0]  ;;  %v3339_v44 = vld [vmem:[#allocation3 + $0x3e8] sm:$0xf]  ;;  %v4128_v45 = vld [vmem:[#allocation3 + $0x3f4] sm:$0xf0]  ;;  %v3608_v46 = vor.u32 %v4193_v32, %v3605_v34 }
 0x17e   :  { %2140 = vmatpush.bf16.msrb.mxu2 %v3672_v48  ;;  %2153 = vmatpush.bf16.msrb.mxu3 %v3800_v49  ;;  %v3736_v47 = vor.u32 %v4225_v33, %v3733_v35  ;;  %v2956_v48 = vor.u32 %v4032_v37, %v2955_v36  ;;  %v3084_v49 = vor.u32 %v4064_v39, %v3083_v38  ;;  %v4120_v10 = vld [vmem:[#allocation3 + $0x3b4] sm:$0xf0]  ;;  %v2907_v19 = vld [vmem:[#allocation3 + $0x88] sm:$0xf] }
 0x17f   :  { %v3340_v51 = vor.u32 %v4128_v45, %v3339_v44  ;;  %v4020_v20 = vld [vmem:[#allocation3 + $0x94] sm:$0xf0]  ;;  %v3308_v25 = vor.u32 %v4120_v10, %v3307_v5  ;;  %v3035_v26 = vld [vmem:[#allocation3 + $0x188] sm:$0xf] }
 0x180   :  { %v4052_v27 = vld [vmem:[#allocation3 + $0x194] sm:$0xf0]  ;;  %v3163_v2 = vld [vmem:[#allocation3 + $0x288] sm:$0xf]  ;;  %v2908_v29 = vor.u32 %v4020_v20, %v2907_v19 }
 0x181   :  { %2115 = vmatpush.bf16.msrb.mxu0 %v3400_v56  ;;  %2128 = vmatpush.bf16.msrb.mxu1 %v3528_v59  ;;  %v3195_v56 = vld [vmem:[#allocation3 + $0x2c8] sm:$0xf]  ;;  %v4092_v59 = vld [vmem:[#allocation3 + $0x2d4] sm:$0xf0]  ;;  %v3036_v16 = vor.u32 %v4052_v27, %v3035_v26 }
 0x182   :  { %2141 = vmatpush.bf16.msrb.mxu2 %v3656_v61  ;;  %2154 = vmatpush.bf16.msrb.mxu3 %v3784_v62  ;;  %v2940_v61 = vor.u32 %v4028_v52, %v2939_v50  ;;  %v3068_v62 = vor.u32 %v4060_v55, %v3067_v54  ;;  %v3196_v0 = vor.u32 %v4092_v59, %v3195_v56  ;;  %v4116_v17 = vld [vmem:[#allocation3 + $0x394] sm:$0xf0]  ;;  %v3019_v33 = vld [vmem:[#allocation3 + $0x168] sm:$0xf] }
 0x183   :  { %v4048_v35 = vld [vmem:[#allocation3 + $0x174] sm:$0xf0]  ;;  %v3147_v36 = vld [vmem:[#allocation3 + $0x268] sm:$0xf] }
 0x184   :  { %v4080_v37 = vld [vmem:[#allocation3 + $0x274] sm:$0xf0]  ;;  %v3275_v38 = vld [vmem:[#allocation3 + $0x368] sm:$0xf] }
 0x185   :  { %2116 = vmatpush.bf16.msrb.mxu0 %v3384_v15  ;;  %2129 = vmatpush.bf16.msrb.mxu1 %v3512_v24  ;;  %v3179_v15 = vld [vmem:[#allocation3 + $0x2a8] sm:$0xf]  ;;  %v4088_v24 = vld [vmem:[#allocation3 + $0x2b4] sm:$0xf0]  ;;  %v3148_v44 = vor.u32 %v4080_v37, %v3147_v36 }
 0x186   :  { %2142 = vmatpush.bf16.msrb.mxu2 %v3640_v12  ;;  %2155 = vmatpush.bf16.msrb.mxu3 %v3768_v13  ;;  %v2924_v12 = vor.u32 %v4024_v63, %v2923_v6  ;;  %v3052_v13 = vor.u32 %v4056_v4, %v3051_v1  ;;  %v3180_v21 = vor.u32 %v4088_v24, %v3179_v15  ;;  %v4112_v39 = vld [vmem:[#allocation3 + $0x374] sm:$0xf0]  ;;  %v3259_v50 = vld [vmem:[#allocation3 + $0x348] sm:$0xf] }
 0x187   :  { %v4012_v43 = vld [vmem:[#allocation3 + $0x54] sm:$0xf0]  ;;  %v3276_v45 = vor.u32 %v4112_v39, %v3275_v38  ;;  %v2859_v54 = vld [vmem:[#allocation3 + $0x28] sm:$0xf] }
 0x188   :  { %v4108_v52 = vld [vmem:[#allocation3 + $0x354] sm:$0xf0]  ;;  %v2987_v60 = vld [vmem:[#allocation3 + $0x128] sm:$0xf] }
 0x189   :  { %2117 = vmatpush.bf16.msrb.mxu0 %v3368_v28  ;;  %2130 = vmatpush.bf16.msrb.mxu1 %v3496_v3  ;;  %v4084_v28 = vld [vmem:[#allocation3 + $0x294] sm:$0xf0]  ;;  %v3291_v3 = vld [vmem:[#allocation3 + $0x388] sm:$0xf]  ;;  %v3260_v59 = vor.u32 %v4108_v52, %v3259_v50 }
 0x18a   :  { %2143 = vmatpush.bf16.msrb.mxu2 %v3624_v30  ;;  %2156 = vmatpush.bf16.msrb.mxu3 %v3752_v31  ;;  %v2891_v30 = vld [vmem:[#allocation3 + $0x68] sm:$0xf]  ;;  %v4016_v31 = vld [vmem:[#allocation3 + $0x74] sm:$0xf0]  ;;  %v3164_v32 = vor.u32 %v4084_v28, %v3163_v2  ;;  %v3292_v34 = vor.u32 %v4116_v17, %v3291_v3 }
 0x18b   :  { %v2892_v40 = vor.u32 %v4016_v31, %v2891_v30  ;;  %v4008_v55 = vld [vmem:[#allocation3 + $0x34] sm:$0xf0]  ;;  %v3243_v6 = vld [vmem:[#allocation3 + $0x328] sm:$0xf] }
 0x18c   :  { %v4040_v58 = vld [vmem:[#allocation3 + $0x134] sm:$0xf0]  ;;  %v2971_v15 = vld [vmem:[#allocation3 + $0x108] sm:$0xf] }
 0x18d   :  { %2118 = vmatpush.bf16.msrb.mxu0 %v3352_v41  ;;  %2131 = vmatpush.bf16.msrb.mxu1 %v3480_v42  ;;  %v3020_v41 = vor.u32 %v4048_v35, %v3019_v33  ;;  %v2875_v42 = vld [vmem:[#allocation3 + $0x48] sm:$0xf]  ;;  %v4104_v63 = vld [vmem:[#allocation3 + $0x334] sm:$0xf0]  ;;  %v2988_v1 = vor.u32 %v4040_v58, %v2987_v60 }
 0x18e   :  { %2144 = vmatpush.bf16.msrb.mxu2 %v3608_v46  ;;  %2157 = vmatpush.bf16.msrb.mxu3 %v3736_v47  ;;  %v3003_v46 = vld [vmem:[#allocation3 + $0x148] sm:$0xf]  ;;  %v4044_v47 = vld [vmem:[#allocation3 + $0x154] sm:$0xf0]  ;;  %v3244_v10 = vor.u32 %v4104_v63, %v3243_v6 }
 0x18f   :  { %v4004_v4 = vld [vmem:[#allocation3 + $0x14] sm:$0xf0]  ;;  %v3227_v19 = vld [vmem:[#allocation3 + $0x308] sm:$0xf] }
 0x190   :  { %2119 = vmatmul.bf16.vlgmr.msrb.gmra.mxu0 %v4612_v14  ;;  %2132 = vmatmul.bf16.vlgmr.msrb.gmra.mxu1 %v4614_v18  ;;  %v4036_v24 = vld [vmem:[#allocation3 + $0x114] sm:$0xf0]  ;;  %v3595_v26 = vld [vmem:[#allocation3 + $0x5e8] sm:$0xf] }
 0x191   :  { %2163 = vmatpush.bf16.msra.mxu0 %v2956_v48  ;;  %2176 = vmatpush.bf16.msra.mxu1 %v3084_v49  ;;  %v3131_v48 = vld [vmem:[#allocation3 + $0x248] sm:$0xf]  ;;  %v4076_v49 = vld [vmem:[#allocation3 + $0x254] sm:$0xf0]  ;;  %v2972_v3 = vor.u32 %v4036_v24, %v2971_v15 }
 0x192   :  { %2189 = vmatpush.bf16.msra.mxu2 %v3212_v53  ;;  %2202 = vmatpush.bf16.msra.mxu3 %v3340_v51  ;;  %v2876_v53 = vor.u32 %v4012_v43, %v2875_v42  ;;  %v3004_v51 = vor.u32 %v4044_v47, %v3003_v46  ;;  %v3132_v56 = vor.u32 %v4076_v49, %v3131_v48  ;;  %v4100_v20 = vld [vmem:[#allocation3 + $0x314] sm:$0xf0]  ;;  %v3723_v2 = vld [vmem:[#allocation3 + $0x6e8] sm:$0xf] }
 0x193   :  { %2145 = vmatmul.bf16.vlgmr.msrb.gmra.mxu2 %v4616_v22  ;;  %2158 = vmatmul.bf16.vlgmr.msrb.gmra.mxu3 %v4618_v23  ;;  %v4192_v27 = vld [vmem:[#allocation3 + $0x5f4] sm:$0xf0]  ;;  %v3228_v31 = vor.u32 %v4100_v20, %v3227_v19  ;;  %v3451_v33 = vld [vmem:[#allocation3 + $0x4c8] sm:$0xf] }
 0x194   :  { %v4224_v17 = vld [vmem:[#allocation3 + $0x6f4] sm:$0xf0]  ;;  %v3579_v38 = vld [vmem:[#allocation3 + $0x5c8] sm:$0xf] }
 0x195   :  { %2164 = vmatpush.bf16.msra.mxu0 %v2940_v61  ;;  %2177 = vmatpush.bf16.msra.mxu1 %v3068_v62  ;;  %v3115_v61 = vld [vmem:[#allocation3 + $0x228] sm:$0xf]  ;;  %v4072_v62 = vld [vmem:[#allocation3 + $0x234] sm:$0xf0]  ;;  %v3724_v36 = vor.u32 %v4224_v17, %v3723_v2 }
 0x196   :  { %2190 = vmatpush.bf16.msra.mxu2 %v3196_v0  ;;  %2203 = vmatpush.bf16.msra.mxu3 %v3324_v11  ;;  %v2843_v0 = vld [vmem:[#allocation3 + $0x8] sm:$0xf]  ;;  %v2860_v11 = vor.u32 %v4008_v55, %v2859_v54  ;;  %v3116_v5 = vor.u32 %v4072_v62, %v3115_v61  ;;  %v4156_v35 = vld [vmem:[#allocation3 + $0x4d4] sm:$0xf0] }
 0x197   :  { %v2844_v28 = vor.u32 %v4004_v4, %v2843_v0  ;;  %v4188_v39 = vld [vmem:[#allocation3 + $0x5d4] sm:$0xf0]  ;;  %v3835_v42 = vld [vmem:[#allocation3 + $0x7c8] sm:$0xf] }
 0x198   :  { %v4252_v43 = vld [vmem:[#allocation3 + $0x7d4] sm:$0xf0]  ;;  %v3435_v46 = vld [vmem:[#allocation3 + $0x4a8] sm:$0xf] }
 0x199   :  { %2165 = vmatpush.bf16.msra.mxu0 %v2924_v12  ;;  %2178 = vmatpush.bf16.msra.mxu1 %v3052_v13  ;;  %v3099_v12 = vld [vmem:[#allocation3 + $0x208] sm:$0xf]  ;;  %v4068_v13 = vld [vmem:[#allocation3 + $0x214] sm:$0xf0]  ;;  %v3836_v49 = vor.u32 %v4252_v43, %v3835_v42 }
 0x19a   :  { %2191 = vmatpush.bf16.msra.mxu2 %v3180_v21  ;;  %2204 = vmatpush.bf16.msra.mxu3 %v3308_v25  ;;  %v3467_v21 = vld [vmem:[#allocation3 + $0x4e8] sm:$0xf]  ;;  %v4160_v25 = vld [vmem:[#allocation3 + $0x4f4] sm:$0xf0]  ;;  %v3100_v30 = vor.u32 %v4068_v13, %v3099_v12 }
 0x19b   :  { %v4152_v47 = vld [vmem:[#allocation3 + $0x4b4] sm:$0xf0]  ;;  %v3563_v50 = vld [vmem:[#allocation3 + $0x5a8] sm:$0xf] }
 0x19c   :  { %v4184_v52 = vld [vmem:[#allocation3 + $0x5b4] sm:$0xf0]  ;;  %v3819_v54 = vld [vmem:[#allocation3 + $0x7a8] sm:$0xf] }
 0x19d   :  { %2166 = vmatpush.bf16.msra.mxu0 %v2908_v29  ;;  %2179 = vmatpush.bf16.msra.mxu1 %v3036_v16  ;;  %v3851_v29 = vld [vmem:[#allocation3 + $0x7e8] sm:$0xf]  ;;  %v4256_v16 = vld [vmem:[#allocation3 + $0x7f4] sm:$0xf0] }
 0x19e   :  { %2192 = vmatpush.bf16.msra.mxu2 %v3164_v32  ;;  %2205 = vmatpush.bf16.msra.mxu3 %v3292_v34  ;;  %v3468_v32 = vor.u32 %v4160_v25, %v3467_v21  ;;  %v3596_v34 = vor.u32 %v4192_v27, %v3595_v26  ;;  %v3852_v37 = vor.u32 %v4256_v16, %v3851_v29  ;;  %v4248_v55 = vld [vmem:[#allocation3 + $0x7b4] sm:$0xf0]  ;;  %v3419_v60 = vld [vmem:[#allocation3 + $0x488] sm:$0xf] }
 0x19f   :  { %v4148_v58 = vld [vmem:[#allocation3 + $0x494] sm:$0xf0]  ;;  %v3820_v62 = vor.u32 %v4248_v55, %v3819_v54  ;;  %v3547_v6 = vld [vmem:[#allocation3 + $0x588] sm:$0xf] }
 0x1a0   :  { %v4180_v63 = vld [vmem:[#allocation3 + $0x594] sm:$0xf0]  ;;  %v3675_v0 = vld [vmem:[#allocation3 + $0x688] sm:$0xf]  ;;  %v3420_v15 = vor.u32 %v4148_v58, %v3419_v60 }
 0x1a1   :  { %2167 = vmatpush.bf16.msra.mxu0 %v2892_v40  ;;  %2180 = vmatpush.bf16.msra.mxu1 %v3020_v41  ;;  %v3707_v40 = vld [vmem:[#allocation3 + $0x6c8] sm:$0xf]  ;;  %v4220_v41 = vld [vmem:[#allocation3 + $0x6d4] sm:$0xf0]  ;;  %v3548_v24 = vor.u32 %v4180_v63, %v3547_v6  ;;  %v4062_v6 = vld [vmem:[#allocation3 + $0x1ec] sm:$0xf] }
 0x1a2   :  { %2193 = vmatpush.bf16.msra.mxu2 %v3148_v44  ;;  %2206 = vmatpush.bf16.msra.mxu3 %v3276_v45  ;;  %v3452_v44 = vor.u32 %v4156_v35, %v3451_v33  ;;  %v3580_v45 = vor.u32 %v4188_v39, %v3579_v38  ;;  %v3708_v48 = vor.u32 %v4220_v41, %v3707_v40  ;;  %v4244_v4 = vld [vmem:[#allocation3 + $0x794] sm:$0xf0]  ;;  %v3531_v19 = vld [vmem:[#allocation3 + $0x568] sm:$0xf]  ;;  %v3085_v63 = vld [vmem:[#allocation3 + $0x1f8] sm:$0xf0] }
 0x1a3   :  { %v4176_v20 = vld [vmem:[#allocation3 + $0x574] sm:$0xf0]  ;;  %v3659_v21 = vld [vmem:[#allocation3 + $0x668] sm:$0xf] }
 0x1a4   :  { %v4208_v25 = vld [vmem:[#allocation3 + $0x674] sm:$0xf0]  ;;  %v3787_v26 = vld [vmem:[#allocation3 + $0x768] sm:$0xf] }
 0x1a5   :  { %2168 = vmatpush.bf16.msra.mxu0 %v2876_v53  ;;  %2181 = vmatpush.bf16.msra.mxu1 %v3004_v51  ;;  %v3691_v53 = vld [vmem:[#allocation3 + $0x6a8] sm:$0xf]  ;;  %v4216_v51 = vld [vmem:[#allocation3 + $0x6b4] sm:$0xf0]  ;;  %v3660_v29 = vor.u32 %v4208_v25, %v3659_v21  ;;  %v4058_v21 = vld [vmem:[#allocation3 + $0x1cc] sm:$0xf] }
 0x1a6   :  { %2194 = vmatpush.bf16.msra.mxu2 %v3132_v56  ;;  %2207 = vmatpush.bf16.msra.mxu3 %v3260_v59  ;;  %v3436_v56 = vor.u32 %v4152_v47, %v3435_v46  ;;  %v3564_v59 = vor.u32 %v4184_v52, %v3563_v50  ;;  %v3692_v61 = vor.u32 %v4216_v51, %v3691_v53  ;;  %v4240_v27 = vld [vmem:[#allocation3 + $0x774] sm:$0xf0]  ;;  %v3771_v33 = vld [vmem:[#allocation3 + $0x748] sm:$0xf] }
 0x1a7   :  { %v4140_v17 = vld [vmem:[#allocation3 + $0x454] sm:$0xf0]  ;;  %v3788_v16 = vor.u32 %v4240_v27, %v3787_v26  ;;  %v3371_v38 = vld [vmem:[#allocation3 + $0x428] sm:$0xf]  ;;  %v3069_v27 = vld [vmem:[#allocation3 + $0x1d8] sm:$0xf0] }
 0x1a8   :  { %v4236_v35 = vld [vmem:[#allocation3 + $0x754] sm:$0xf0]  ;;  %v3499_v42 = vld [vmem:[#allocation3 + $0x528] sm:$0xf] }
 0x1a9   :  { %2169 = vmatpush.bf16.msra.mxu0 %v2860_v11  ;;  %2182 = vmatpush.bf16.msra.mxu1 %v2988_v1  ;;  %v4212_v11 = vld [vmem:[#allocation3 + $0x694] sm:$0xf0]  ;;  %v3803_v1 = vld [vmem:[#allocation3 + $0x788] sm:$0xf]  ;;  %v3772_v41 = vor.u32 %v4236_v35, %v3771_v33 }
 0x1aa   :  { %2195 = vmatpush.bf16.msra.mxu2 %v3116_v5  ;;  %2208 = vmatpush.bf16.msra.mxu3 %v3244_v10  ;;  %v3403_v5 = vld [vmem:[#allocation3 + $0x468] sm:$0xf]  ;;  %v4144_v10 = vld [vmem:[#allocation3 + $0x474] sm:$0xf0]  ;;  %v3676_v12 = vor.u32 %v4212_v11, %v3675_v0  ;;  %v3804_v13 = vor.u32 %v4244_v4, %v3803_v1  ;;  %v4094_v0 = vld [vmem:[#allocation3 + $0x2ec] sm:$0xf] }
 0x1ab   :  { %v3404_v2 = vor.u32 %v4144_v10, %v3403_v5  ;;  %v4136_v39 = vld [vmem:[#allocation3 + $0x434] sm:$0xf0]  ;;  %v3755_v46 = vld [vmem:[#allocation3 + $0x728] sm:$0xf]  ;;  %v3213_v4 = vld [vmem:[#allocation3 + $0x2f8] sm:$0xf0] }
 0x1ac   :  { %v4168_v43 = vld [vmem:[#allocation3 + $0x534] sm:$0xf0]  ;;  %v3483_v53 = vld [vmem:[#allocation3 + $0x508] sm:$0xf]  ;;  %v3216_v25 = vor.u32 %v4094_v0, %v3213_v4  ;;  %v4046_v0 = vld [vmem:[#allocation3 + $0x16c] sm:$0xf] }
 0x1ad   :  { %2170 = vmatpush.bf16.msra.mxu0 %v2844_v28  ;;  %2183 = vmatpush.bf16.msra.mxu1 %v2972_v3  ;;  %v3532_v28 = vor.u32 %v4176_v20, %v3531_v19  ;;  %v3387_v3 = vld [vmem:[#allocation3 + $0x448] sm:$0xf]  ;;  %v4232_v47 = vld [vmem:[#allocation3 + $0x734] sm:$0xf0]  ;;  %v3500_v50 = vor.u32 %v4168_v43, %v3499_v42  ;;  %v4026_v19 = vld [vmem:[#allocation3 + $0xcc] sm:$0xf] }
 0x1ae   :  { %2196 = vmatpush.bf16.msra.mxu2 %v3100_v30  ;;  %2209 = vmatpush.bf16.msra.mxu3 %v3228_v31  ;;  %v3515_v30 = vld [vmem:[#allocation3 + $0x548] sm:$0xf]  ;;  %v4172_v31 = vld [vmem:[#allocation3 + $0x554] sm:$0xf0]  ;;  %v3756_v55 = vor.u32 %v4232_v47, %v3755_v46  ;;  %v2941_v20 = vld [vmem:[#allocation3 + $0xd8] sm:$0xf0] }
 0x1af   :  { %v4132_v52 = vld [vmem:[#allocation3 + $0x414] sm:$0xf0]  ;;  %v3739_v60 = vld [vmem:[#allocation3 + $0x708] sm:$0xf]  ;;  %v4018_v47 = vld [vmem:[#allocation3 + $0x8c] sm:$0xf] }
 0x1b0   :  { %2171 = vmatmul.bf16.vlgmr.msra.gmra.mxu0 %v4594_v57  ;;  %2184 = vmatmul.bf16.vlgmr.msra.gmra.mxu1 %v4596_v7  ;;  %v4164_v51 = vld [vmem:[#allocation3 + $0x514] sm:$0xf0] }
 0x1b1   :  { %2215 = vmatpush.bf16.msrb.mxu0 %v3468_v32  ;;  %2228 = vmatpush.bf16.msrb.mxu1 %v3596_v34  ;;  %v3643_v32 = vld [vmem:[#allocation3 + $0x648] sm:$0xf]  ;;  %v4204_v34 = vld [vmem:[#allocation3 + $0x654] sm:$0xf0]  ;;  %v3484_v1 = vor.u32 %v4164_v51, %v3483_v53  ;;  %v3037_v53 = vld [vmem:[#allocation3 + $0x198] sm:$0xf0] }
 0x1b2   :  { %2241 = vmatpush.bf16.msrb.mxu2 %v3724_v36  ;;  %2254 = vmatpush.bf16.msrb.mxu3 %v3852_v37  ;;  %v3388_v36 = vor.u32 %v4140_v17, %v3387_v3  ;;  %v3516_v37 = vor.u32 %v4172_v31, %v3515_v30  ;;  %v3644_v40 = vor.u32 %v4204_v34, %v3643_v32  ;;  %v4228_v58 = vld [vmem:[#allocation3 + $0x714] sm:$0xf0]  ;;  %v3197_v3 = vld [vmem:[#allocation3 + $0x2d8] sm:$0xf0]  ;;  %v4122_v17 = vld [vmem:[#allocation3 + $0x3cc] sm:$0xf] }
 0x1b3   :  { %2197 = vmatmul.bf16.vlgmr.msra.gmra.mxu2 %v4598_v8  ;;  %2210 = vmatmul.bf16.vlgmr.msra.gmra.mxu3 %v4600_v9  ;;  %v3740_v10 = vor.u32 %v4228_v58, %v3739_v60  ;;  %v3072_v30 = vor.u32 %v4058_v21, %v3069_v27  ;;  %v4022_v31 = vld [vmem:[#allocation3 + $0xac] sm:$0xf]  ;;  %v2925_v32 = vld [vmem:[#allocation3 + $0xb8] sm:$0xf0] }
 0x1b4   :  { %v4082_v51 = vld [vmem:[#allocation3 + $0x28c] sm:$0xf] }
 0x1b5   :  { %2216 = vmatpush.bf16.msrb.mxu0 %v3452_v44  ;;  %2229 = vmatpush.bf16.msrb.mxu1 %v3580_v45  ;;  %v3627_v44 = vld [vmem:[#allocation3 + $0x628] sm:$0xf]  ;;  %v4200_v45 = vld [vmem:[#allocation3 + $0x634] sm:$0xf0] }
 0x1b6   :  { %2242 = vmatpush.bf16.msrb.mxu2 %v3708_v48  ;;  %2255 = vmatpush.bf16.msrb.mxu3 %v3836_v49  ;;  %v3355_v48 = vld [vmem:[#allocation3 + $0x408] sm:$0xf]  ;;  %v3372_v49 = vor.u32 %v4136_v39, %v3371_v38  ;;  %v3628_v54 = vor.u32 %v4200_v45, %v3627_v44  ;;  %v4086_v38 = vld [vmem:[#allocation3 + $0x2ac] sm:$0xf]  ;;  %v3181_v39 = vld [vmem:[#allocation3 + $0x2b8] sm:$0xf0]  ;;  %v2928_v44 = vor.u32 %v4022_v31, %v2925_v32 }
 0x1b7   :  { %v3356_v11 = vor.u32 %v4132_v52, %v3355_v48  ;;  %v2909_v48 = vld [vmem:[#allocation3 + $0x98] sm:$0xf0]  ;;  %v4050_v52 = vld [vmem:[#allocation3 + $0x18c] sm:$0xf] }
 0x1b8   :  { %v2912_v60 = vor.u32 %v4018_v47, %v2909_v48  ;;  %v3040_v58 = vor.u32 %v4050_v52, %v3037_v53  ;;  %v4106_v31 = vld [vmem:[#allocation3 + $0x34c] sm:$0xf]  ;;  %v3261_v32 = vld [vmem:[#allocation3 + $0x358] sm:$0xf0] }
 0x1b9   :  { %2217 = vmatpush.bf16.msrb.mxu0 %v3436_v56  ;;  %2230 = vmatpush.bf16.msrb.mxu1 %v3564_v59  ;;  %v3611_v56 = vld [vmem:[#allocation3 + $0x608] sm:$0xf]  ;;  %v4196_v59 = vld [vmem:[#allocation3 + $0x614] sm:$0xf0] }
 0x1ba   :  { %2243 = vmatpush.bf16.msrb.mxu2 %v3692_v61  ;;  %2256 = vmatpush.bf16.msrb.mxu3 %v3820_v62  ;;  %v4030_v61 = vld [vmem:[#allocation3 + $0xec] sm:$0xf]  ;;  %v2957_v62 = vld [vmem:[#allocation3 + $0xf8] sm:$0xf0]  ;;  %v3612_v5 = vor.u32 %v4196_v59, %v3611_v56 }
 0x1bb   :  { %v4114_v56 = vld [vmem:[#allocation3 + $0x38c] sm:$0xf]  ;;  %v3293_v59 = vld [vmem:[#allocation3 + $0x398] sm:$0xf0] }
 0x1bd   :  { %2218 = vmatpush.bf16.msrb.mxu0 %v3420_v15  ;;  %2231 = vmatpush.bf16.msrb.mxu1 %v3548_v24  ;;  %v4126_v15 = vld [vmem:[#allocation3 + $0x3ec] sm:$0xf]  ;;  %v3341_v24 = vld [vmem:[#allocation3 + $0x3f8] sm:$0xf0] }
 0x1be   :  { %2244 = vmatpush.bf16.msrb.mxu2 %v3676_v12  ;;  %2257 = vmatpush.bf16.msrb.mxu3 %v3804_v13  ;;  %v2960_v12 = vor.u32 %v4030_v61, %v2957_v62  ;;  %v3088_v13 = vor.u32 %v4062_v6, %v3085_v63  ;;  %v3344_v26 = vor.u32 %v4126_v15, %v3341_v24  ;;  %v4014_v61 = vld [vmem:[#allocation3 + $0x6c] sm:$0xf]  ;;  %v2893_v62 = vld [vmem:[#allocation3 + $0x78] sm:$0xf0] }
 0x1bf   :  { %v3296_v63 = vor.u32 %v4114_v56, %v3293_v59  ;;  %v3149_v24 = vld [vmem:[#allocation3 + $0x278] sm:$0xf0] }
 0x1c1   :  { %2219 = vmatpush.bf16.msrb.mxu0 %v3404_v2  ;;  %2232 = vmatpush.bf16.msrb.mxu1 %v3532_v28  ;;  %v4090_v2 = vld [vmem:[#allocation3 + $0x2cc] sm:$0xf]  ;;  %v4639_v28 = vld [vmem:[%s4792_s6] sm:$0xf] }
 0x1c2   :  { %2245 = vmatpush.bf16.msrb.mxu2 %v3660_v29  ;;  %2258 = vmatpush.bf16.msrb.mxu3 %v3788_v16  ;;  %v3325_v29 = vld [vmem:[#allocation3 + $0x3d8] sm:$0xf0]  ;;  %v2944_v16 = vor.u32 %v4026_v19, %v2941_v20  ;;  %v667_v34 = vperm.slane %v4639_v28, 0  ;;  %v3200_v33 = vor.u32 %v4090_v2, %v3197_v3  ;;  %v2896_v20 = vor.u32 %v4014_v61, %v2893_v62  ;;  %v4098_v61 = vld [vmem:[#allocation3 + $0x30c] sm:$0xf] }
 0x1c3   :  { %v3328_v35 = vor.u32 %v4122_v17, %v3325_v29  ;;  %v4042_v17 = vld [vmem:[#allocation3 + $0x14c] sm:$0xf]  ;;  %v3005_v29 = vld [vmem:[#allocation3 + $0x158] sm:$0xf0] }
 0x1c5   :  { %2220 = vmatpush.bf16.msrb.mxu0 %v3388_v36  ;;  %2233 = vmatpush.bf16.msrb.mxu1 %v3516_v37  ;;  %v4054_v36 = vld [vmem:[#allocation3 + $0x1ac] sm:$0xf]  ;;  %v3053_v37 = vld [vmem:[#allocation3 + $0x1b8] sm:$0xf0] }
 0x1c6   :  { %2246 = vmatpush.bf16.msrb.mxu2 %v3644_v40  ;;  %2259 = vmatpush.bf16.msrb.mxu3 %v3772_v41  ;;  %v4118_v40 = vld [vmem:[#allocation3 + $0x3ac] sm:$0xf]  ;;  %v3309_v41 = vld [vmem:[#allocation3 + $0x3b8] sm:$0xf0]  ;;  %v3056_v45 = vor.u32 %v4054_v36, %v3053_v37 }
 0x1c7   :  { %v2861_v36 = vld [vmem:[#allocation3 + $0x38] sm:$0xf0] }
 0x1c9   :  { %2221 = vmatpush.bf16.msrb.mxu0 %v3372_v49  ;;  %2234 = vmatpush.bf16.msrb.mxu1 %v3500_v50  ;;  %v3184_v49 = vor.u32 %v4086_v38, %v3181_v39  ;;  %v3312_v50 = vor.u32 %v4118_v40, %v3309_v41  ;;  %v3264_v38 = vor.u32 %v4106_v31, %v3261_v32  ;;  %v4038_v39 = vld [vmem:[#allocation3 + $0x12c] sm:$0xf]  ;;  %v2989_v40 = vld [vmem:[#allocation3 + $0x138] sm:$0xf0] }
 0x1ca   :  { %2247 = vmatpush.bf16.msrb.mxu2 %v3628_v54  ;;  %2260 = vmatpush.bf16.msrb.mxu3 %v3756_v55  ;;  %v3165_v55 = vld [vmem:[#allocation3 + $0x298] sm:$0xf0]  ;;  %v4070_v41 = vld [vmem:[#allocation3 + $0x22c] sm:$0xf]  ;;  %v2992_v52 = vor.u32 %v4038_v39, %v2989_v40 }
 0x1cb   :  { %v3168_v6 = vor.u32 %v4082_v51, %v3165_v55  ;;  %v2845_v51 = vld [vmem:[#allocation3 + $0x18] sm:$0xf0]  ;;  %v4186_v31 = vld [vmem:[#allocation3 + $0x5cc] sm:$0xf] }
 0x1cc   :  { %v1964_v42 = vpop.f32.mrf.mxu0  ;;  %v1977_v43 = vpop.f32.mrf.mxu1  ;;  %v2973_v55 = vld [vmem:[#allocation3 + $0x118] sm:$0xf0]  ;;  %v4150_v40 = vld [vmem:[#allocation3 + $0x4ac] sm:$0xf] }
 0x1cd   :  { %2222 = vmatpush.bf16.msrb.mxu0 %v3356_v11  ;;  %2235 = vmatpush.bf16.msrb.mxu1 %v3484_v1  ;;  %v1965_v46 = vadd.f32 %v1964_v42, %v667_v34  ;;  %v3021_v11 = vld [vmem:[#allocation3 + $0x178] sm:$0xf0]  ;;  %v4078_v1 = vld [vmem:[#allocation3 + $0x26c] sm:$0xf] }
 0x1ce   :  { %2248 = vmatpush.bf16.msrb.mxu2 %v3612_v5  ;;  %2261 = vmatpush.bf16.msrb.mxu3 %v3740_v10  ;;  %v4110_v5 = vld [vmem:[#allocation3 + $0x36c] sm:$0xf]  ;;  %v3277_v10 = vld [vmem:[#allocation3 + $0x378] sm:$0xf0]  ;;  %v3024_v21 = vor.u32 %v4046_v0, %v3021_v11  ;;  %v3152_v2 = vor.u32 %v4078_v1, %v3149_v24 }
 0x1cf   :  { %v1978_v54 = vadd.f32 %v1977_v43, %v1965_v46  ;;  %v3280_v3 = vor.u32 %v4110_v5, %v3277_v10  ;;  %v3245_v46 = vld [vmem:[#allocation3 + $0x338] sm:$0xf0]  ;;  %v4190_v11 = vld [vmem:[#allocation3 + $0x5ec] sm:$0xf] }
 0x1d0   :  { %2223 = vmatmul.bf16.vlgmr.msrb.gmra.mxu0 %v4612_v14  ;;  %2236 = vmatmul.bf16.vlgmr.msrb.gmra.mxu1 %v4614_v18  ;;  %v3469_v0 = vld [vmem:[#allocation3 + $0x4f8] sm:$0xf0]  ;;  %v4254_v10 = vld [vmem:[#allocation3 + $0x7ec] sm:$0xf] }
 0x1d1   :  { %2267 = vmatpush.bf16.msra.mxu0 %v2960_v12  ;;  %2280 = vmatpush.bf16.msra.mxu1 %v3088_v13  ;;  %v3597_v1 = vld [vmem:[#allocation3 + $0x5f8] sm:$0xf0] }
 0x1d2   :  { %2293 = vmatpush.bf16.msra.mxu2 %v3216_v25  ;;  %2306 = vmatpush.bf16.msra.mxu3 %v3344_v26  ;;  %v4010_v25 = vld [vmem:[#allocation3 + $0x4c] sm:$0xf]  ;;  %v2877_v26 = vld [vmem:[#allocation3 + $0x58] sm:$0xf0] }
 0x1d3   :  { %2249 = vmatmul.bf16.vlgmr.msrb.gmra.mxu2 %v4616_v22  ;;  %2262 = vmatmul.bf16.vlgmr.msrb.gmra.mxu3 %v4618_v23  ;;  %v1990_v4 = vpop.f32.mrf.mxu2  ;;  %v2003_v15 = vpop.f32.mrf.mxu3  ;;  %v2880_v34 = vor.u32 %v4010_v25, %v2877_v26  ;;  %v3725_v5 = vld [vmem:[#allocation3 + $0x6f8] sm:$0xf0] }
 0x1d4   :  { %v1991_v12 = vadd.f32 %v1990_v4, %v1978_v54  ;;  %v1966_v13 = vpop.f32.mrf.mxu0  ;;  %v1979_v19 = vpop.f32.mrf.mxu1  ;;  %v4034_v54 = vld [vmem:[#allocation3 + $0x10c] sm:$0xf]  ;;  %v3581_v32 = vld [vmem:[#allocation3 + $0x5d8] sm:$0xf0] }
 0x1d5   :  { %2268 = vmatpush.bf16.msra.mxu0 %v2944_v16  ;;  %2281 = vmatpush.bf16.msra.mxu1 %v3072_v30  ;;  %v4074_v16 = vld [vmem:[#allocation3 + $0x24c] sm:$0xf]  ;;  %v3133_v30 = vld [vmem:[#allocation3 + $0x258] sm:$0xf0]  ;;  %v2976_v24 = vor.u32 %v4034_v54, %v2973_v55  ;;  %v3584_v39 = vor.u32 %v4186_v31, %v3581_v32  ;;  %v668_v54 = vperm.slane %v4639_v28, 1 }
 0x1d6   :  { %2294 = vmatpush.bf16.msra.mxu2 %v3200_v33  ;;  %2307 = vmatpush.bf16.msra.mxu3 %v3328_v35  ;;  %v2004_v27 = vadd.f32 %v2003_v15, %v1991_v12  ;;  %v3008_v33 = vor.u32 %v4042_v17, %v3005_v29  ;;  %v4006_v35 = vld [vmem:[#allocation3 + $0x2c] sm:$0xf]  ;;  %v3136_v37 = vor.u32 %v4074_v16, %v3133_v30  ;;  %v3853_v12 = vld [vmem:[#allocation3 + $0x7f8] sm:$0xf0] }
 0x1d7   :  { %v4222_v4 = vld [vmem:[#allocation3 + $0x6ec] sm:$0xf]  ;;  %v3856_v17 = vor.u32 %v4254_v10, %v3853_v12  ;;  %v3533_v10 = vld [vmem:[#allocation3 + $0x578] sm:$0xf0] }
 0x1d8   :  { %v4146_v55 = vld [vmem:[#allocation3 + $0x48c] sm:$0xf] }
 0x1d9   :  { %2269 = vmatpush.bf16.msra.mxu0 %v2928_v44  ;;  %2282 = vmatpush.bf16.msra.mxu1 %v3056_v45  ;;  %v3117_v44 = vld [vmem:[#allocation3 + $0x238] sm:$0xf0]  ;;  %v4102_v45 = vld [vmem:[#allocation3 + $0x32c] sm:$0xf] }
 0x1da   :  { %2295 = vmatpush.bf16.msra.mxu2 %v3184_v49  ;;  %2308 = vmatpush.bf16.msra.mxu3 %v3312_v50  ;;  %v4002_v49 = vld [vmem:[#allocation3 + $0xc] sm:$0xf]  ;;  %v2864_v50 = vor.u32 %v4006_v35, %v2861_v36  ;;  %v3120_v56 = vor.u32 %v4070_v41, %v3117_v44  ;;  %v3248_v59 = vor.u32 %v4102_v45, %v3245_v46  ;;  %v3837_v36 = vld [vmem:[#allocation3 + $0x7d8] sm:$0xf0] }
 0x1db   :  { %v1992_v42 = vpop.f32.mrf.mxu2  ;;  %v2005_v43 = vpop.f32.mrf.mxu3  ;;  %v2848_v15 = vor.u32 %v4002_v49, %v2845_v51  ;;  %v4250_v35 = vld [vmem:[#allocation3 + $0x7cc] sm:$0xf]  ;;  %v3437_v41 = vld [vmem:[#allocation3 + $0x4b8] sm:$0xf0] }
 0x1dc   :  { %v2016_v47 = vpop.f32.mrf.mxu0  ;;  %v2029_v48 = vpop.f32.mrf.mxu1  ;;  %v3840_v43 = vor.u32 %v4250_v35, %v3837_v36  ;;  %v4182_v44 = vld [vmem:[#allocation3 + $0x5ac] sm:$0xf]  ;;  %v3565_v45 = vld [vmem:[#allocation3 + $0x5b8] sm:$0xf0] }
 0x1dd   :  { %2270 = vmatpush.bf16.msra.mxu0 %v2912_v60  ;;  %2283 = vmatpush.bf16.msra.mxu1 %v3040_v58  ;;  %v2017_v53 = vadd.f32 %v2016_v47, %v2004_v27  ;;  %v4066_v60 = vld [vmem:[#allocation3 + $0x20c] sm:$0xf]  ;;  %v3101_v58 = vld [vmem:[#allocation3 + $0x218] sm:$0xf0] }
 0x1de   :  { %2296 = vmatpush.bf16.msra.mxu2 %v3168_v6  ;;  %2309 = vmatpush.bf16.msra.mxu3 %v3296_v63  ;;  %v3229_v6 = vld [vmem:[#allocation3 + $0x318] sm:$0xf0]  ;;  %v4158_v63 = vld [vmem:[#allocation3 + $0x4ec] sm:$0xf]  ;;  %v3104_v13 = vor.u32 %v4066_v60, %v3101_v58 }
 0x1df   :  { %v2030_v62 = vadd.f32 %v2029_v48, %v2017_v53  ;;  %v3232_v19 = vor.u32 %v4098_v61, %v3229_v6  ;;  %v4154_v27 = vld [vmem:[#allocation3 + $0x4cc] sm:$0xf]  ;;  %v3693_v47 = vld [vmem:[#allocation3 + $0x6b8] sm:$0xf0] }
 0x1e0   :  { %v4214_v46 = vld [vmem:[#allocation3 + $0x6ac] sm:$0xf]  ;;  %v3821_v49 = vld [vmem:[#allocation3 + $0x7b8] sm:$0xf0] }
 0x1e1   :  { %2271 = vmatpush.bf16.msra.mxu0 %v2896_v20  ;;  %2284 = vmatpush.bf16.msra.mxu1 %v3024_v21  ;;  %v3472_v20 = vor.u32 %v4158_v63, %v3469_v0  ;;  %v3600_v21 = vor.u32 %v4190_v11, %v3597_v1  ;;  %v4246_v48 = vld [vmem:[#allocation3 + $0x7ac] sm:$0xf]  ;;  %v3549_v60 = vld [vmem:[#allocation3 + $0x598] sm:$0xf0] }
 0x1e2   :  { %2297 = vmatpush.bf16.msra.mxu2 %v3152_v2  ;;  %2310 = vmatpush.bf16.msra.mxu3 %v3280_v3  ;;  %v3453_v2 = vld [vmem:[#allocation3 + $0x4d8] sm:$0xf0]  ;;  %v3728_v3 = vor.u32 %v4222_v4, %v3725_v5  ;;  %v4210_v58 = vld [vmem:[#allocation3 + $0x68c] sm:$0xf] }
 0x1e3   :  { %v2042_v25 = vpop.f32.mrf.mxu2  ;;  %v2055_v26 = vpop.f32.mrf.mxu3  ;;  %v4242_v61 = vld [vmem:[#allocation3 + $0x78c] sm:$0xf]  ;;  %v3405_v4 = vld [vmem:[#allocation3 + $0x478] sm:$0xf0] }
 0x1e4   :  { %v2043_v29 = vadd.f32 %v2042_v25, %v2030_v62  ;;  %v2018_v16 = vpop.f32.mrf.mxu0  ;;  %v2031_v30 = vpop.f32.mrf.mxu1  ;;  %v4142_v1 = vld [vmem:[#allocation3 + $0x46c] sm:$0xf]  ;;  %v3773_v35 = vld [vmem:[#allocation3 + $0x758] sm:$0xf0] }
 0x1e5   :  { %2272 = vmatpush.bf16.msra.mxu0 %v2880_v34  ;;  %2285 = vmatpush.bf16.msra.mxu1 %v3008_v33  ;;  %v4218_v34 = vld [vmem:[#allocation3 + $0x6cc] sm:$0xf]  ;;  %v3709_v33 = vld [vmem:[#allocation3 + $0x6d8] sm:$0xf0]  ;;  %v3408_v25 = vor.u32 %v4142_v1, %v3405_v4 }
 0x1e6   :  { %2298 = vmatpush.bf16.msra.mxu2 %v3136_v37  ;;  %2311 = vmatpush.bf16.msra.mxu3 %v3264_v38  ;;  %v4646_v37 = vadd.f32 %v2055_v26, %v2043_v29  ;;  %v3456_v38 = vor.u32 %v4154_v27, %v3453_v2  ;;  %v3712_v42 = vor.u32 %v4218_v34, %v3709_v33  ;;  %v4174_v5 = vld [vmem:[#allocation3 + $0x56c] sm:$0xf]  ;;  %v3389_v2 = vld [vmem:[#allocation3 + $0x458] sm:$0xf0] }
 0x1e7   :  { %v4206_v12 = vld [vmem:[#allocation3 + $0x66c] sm:$0xf]  ;;  %v3536_v26 = vor.u32 %v4174_v5, %v3533_v10  ;;  %v3517_v16 = vld [vmem:[#allocation3 + $0x558] sm:$0xf0] }
 0x1e8   :  { %v4138_v27 = vld [vmem:[#allocation3 + $0x44c] sm:$0xf]  ;;  %v3645_v34 = vld [vmem:[#allocation3 + $0x658] sm:$0xf0] }
 0x1e9   :  { %2273 = vmatpush.bf16.msra.mxu0 %v2864_v50  ;;  %2286 = vmatpush.bf16.msra.mxu1 %v2992_v52  ;;  %v3440_v50 = vor.u32 %v4150_v40, %v3437_v41  ;;  %v3568_v52 = vor.u32 %v4182_v44, %v3565_v45  ;;  %v4170_v29 = vld [vmem:[#allocation3 + $0x54c] sm:$0xf]  ;;  %v3392_v40 = vor.u32 %v4138_v27, %v3389_v2 }
 0x1ea   :  { %2299 = vmatpush.bf16.msra.mxu2 %v3120_v56  ;;  %2312 = vmatpush.bf16.msra.mxu3 %v3248_v59  ;;  %v3421_v56 = vld [vmem:[#allocation3 + $0x498] sm:$0xf0]  ;;  %v4178_v59 = vld [vmem:[#allocation3 + $0x58c] sm:$0xf]  ;;  %v3520_v41 = vor.u32 %v4170_v29, %v3517_v16 }
 0x1eb   :  { %v2044_v53 = vpop.f32.mrf.mxu2  ;;  %v2057_v51 = vpop.f32.mrf.mxu3  ;;  %v3424_v0 = vor.u32 %v4146_v55, %v3421_v56  ;;  %v3552_v11 = vor.u32 %v4178_v59, %v3549_v60  ;;  %v4202_v30 = vld [vmem:[#allocation3 + $0x64c] sm:$0xf]  ;;  %v3357_v56 = vld [vmem:[#allocation3 + $0x418] sm:$0xf0] }
 0x1ec   :  { %v4234_v33 = vld [vmem:[#allocation3 + $0x74c] sm:$0xf]  ;;  %v3648_v45 = vor.u32 %v4202_v30, %v3645_v34  ;;  %v3757_v53 = vld [vmem:[#allocation3 + $0x738] sm:$0xf0] }
 0x1ed   :  { %2274 = vmatpush.bf16.msra.mxu0 %v2848_v15  ;;  %2287 = vmatpush.bf16.msra.mxu1 %v2976_v24  ;;  %v2068_v62 = vpop.f32.mrf.mxu0  ;;  %v2081_v6 = vpop.f32.mrf.mxu1  ;;  %v4130_v55 = vld [vmem:[#allocation3 + $0x40c] sm:$0xf]  ;;  %v3485_v60 = vld [vmem:[#allocation3 + $0x518] sm:$0xf0] }
 0x1ee   :  { %2300 = vmatpush.bf16.msra.mxu2 %v3104_v13  ;;  %2313 = vmatpush.bf16.msra.mxu3 %v3232_v19  ;;  %v2069_v63 = vadd.f32 %v2068_v62, %v668_v54  ;;  %v3661_v19 = vld [vmem:[#allocation3 + $0x678] sm:$0xf0]  ;;  %v4162_v59 = vld [vmem:[#allocation3 + $0x50c] sm:$0xf] }
 0x1ef   :  { %v4226_v62 = vld [vmem:[#allocation3 + $0x70c] sm:$0xf] }
 0x1f0   :  { %2275 = vmatmul.bf16.vlgmr.msra.gmra.mxu0 %v4594_v57  ;;  %2288 = vmatmul.bf16.vlgmr.msra.gmra.mxu1 %v4596_v7  ;;  %v3696_v57 = vor.u32 %v4214_v46, %v3693_v47  ;;  %v3824_v7 = vor.u32 %v4246_v48, %v3821_v49  ;;  %v2082_v13 = vadd.f32 %v2081_v6, %v2069_v63  ;;  %v4166_v47 = vld [vmem:[#allocation3 + $0x52c] sm:$0xf]  ;;  %v3501_v48 = vld [vmem:[#allocation3 + $0x538] sm:$0xf0] }
 0x1f1   :  { %2319 = vmatpush.bf16.msrb.mxu0 %v3472_v20  ;;  %2332 = vmatpush.bf16.msrb.mxu1 %v3600_v21  ;;  %v4238_v20 = vld [vmem:[#allocation3 + $0x76c] sm:$0xf]  ;;  %v3789_v21 = vld [vmem:[#allocation3 + $0x778] sm:$0xf0]  ;;  %v3776_v46 = vor.u32 %v4234_v33, %v3773_v35  ;;  %v3504_v54 = vor.u32 %v4166_v47, %v3501_v48  ;;  %v3360_v63 = vor.u32 %v4130_v55, %v3357_v56  ;;  %v670_v48 = vperm.slane %v4639_v28, 3 }
 0x1f2   :  { %2345 = vmatpush.bf16.msrb.mxu2 %v3728_v3  ;;  %2358 = vmatpush.bf16.msrb.mxu3 %v3856_v17  ;;  %v3664_v3 = vor.u32 %v4206_v12, %v3661_v19  ;;  %v3792_v17 = vor.u32 %v4238_v20, %v3789_v21  ;;  %v4198_v49 = vld [vmem:[#allocation3 + $0x62c] sm:$0xf]  ;;  %v3741_v6 = vld [vmem:[#allocation3 + $0x718] sm:$0xf0] }
 0x1f3   :  { %2301 = vmatmul.bf16.vlgmr.msra.gmra.mxu2 %v4598_v8  ;;  %2314 = vmatmul.bf16.vlgmr.msra.gmra.mxu3 %v4600_v9  ;;  %v3677_v8 = vld [vmem:[#allocation3 + $0x698] sm:$0xf0]  ;;  %v3744_v1 = vor.u32 %v4226_v62, %v3741_v6 }
 0x1f4   :  { %v3805_v9 = vld [vmem:[#allocation3 + $0x798] sm:$0xf0]  ;;  %v3680_v15 = vor.u32 %v4210_v58, %v3677_v8  ;;  %v4194_v58 = vld [vmem:[#allocation3 + $0x60c] sm:$0xf] }
 0x1f5   :  { %2320 = vmatpush.bf16.msrb.mxu0 %v3456_v38  ;;  %2333 = vmatpush.bf16.msrb.mxu1 %v3584_v39  ;;  %v3808_v24 = vor.u32 %v4242_v61, %v3805_v9  ;;  %v2070_v38 = vpop.f32.mrf.mxu0  ;;  %v2083_v39 = vpop.f32.mrf.mxu1  ;;  %v3613_v9 = vld [vmem:[#allocation3 + $0x618] sm:$0xf0] }
 0x1f6   :  { %2346 = vmatpush.bf16.msrb.mxu2 %v3712_v42  ;;  %2359 = vmatpush.bf16.msrb.mxu3 %v3840_v43  ;;  %v2094_v31 = vpop.f32.mrf.mxu2  ;;  %v2107_v32 = vpop.f32.mrf.mxu3  ;;  %v4134_v42 = vld [vmem:[#allocation3 + $0x42c] sm:$0xf]  ;;  %v3373_v43 = vld [vmem:[#allocation3 + $0x438] sm:$0xf0] }
 0x1f7   :  { %v2095_v36 = vadd.f32 %v2094_v31, %v2082_v13  ;;  %v3376_v51 = vor.u32 %v4134_v42, %v3373_v43 }
 0x1f9   :  { %2321 = vmatpush.bf16.msrb.mxu0 %v3440_v50  ;;  %2334 = vmatpush.bf16.msrb.mxu1 %v3568_v52  ;;  %v2108_v44 = vadd.f32 %v2107_v32, %v2095_v36  ;;  %v3629_v50 = vld [vmem:[#allocation3 + $0x638] sm:$0xf0]  ;;  %v4230_v52 = vld [vmem:[#allocation3 + $0x72c] sm:$0xf] }
 0x1fa   :  { %2347 = vmatpush.bf16.msrb.mxu2 %v3696_v57  ;;  %2360 = vmatpush.bf16.msrb.mxu3 %v3824_v7  ;;  %v3632_v57 = vor.u32 %v4198_v49, %v3629_v50  ;;  %v3760_v7 = vor.u32 %v4230_v52, %v3757_v53 }
 0x1fd   :  { %2322 = vmatpush.bf16.msrb.mxu0 %v3424_v0  ;;  %2335 = vmatpush.bf16.msrb.mxu1 %v3552_v11  ;;  %v3488_v0 = vor.u32 %v4162_v59, %v3485_v60  ;;  %v3616_v11 = vor.u32 %v4194_v58, %v3613_v9 }
 0x1fe   :  { %2348 = vmatpush.bf16.msrb.mxu2 %v3680_v15  ;;  %2361 = vmatpush.bf16.msrb.mxu3 %v3808_v24  ;;  %v2096_v8 = vpop.f32.mrf.mxu2  ;;  %v2109_v61 = vpop.f32.mrf.mxu3 }
 0x201   :  { %2323 = vmatpush.bf16.msrb.mxu0 %v3408_v25  ;;  %2336 = vmatpush.bf16.msrb.mxu1 %v3536_v26 }
 0x202   :  { %2349 = vmatpush.bf16.msrb.mxu2 %v3664_v3  ;;  %2362 = vmatpush.bf16.msrb.mxu3 %v3792_v17 }
 0x205   :  { %2324 = vmatpush.bf16.msrb.mxu0 %v3392_v40  ;;  %2337 = vmatpush.bf16.msrb.mxu1 %v3520_v41 }
 0x206   :  { %2350 = vmatpush.bf16.msrb.mxu2 %v3648_v45  ;;  %2363 = vmatpush.bf16.msrb.mxu3 %v3776_v46 }
 0x209   :  { %2325 = vmatpush.bf16.msrb.mxu0 %v3376_v51  ;;  %2338 = vmatpush.bf16.msrb.mxu1 %v3504_v54 }
 0x20a   :  { %2351 = vmatpush.bf16.msrb.mxu2 %v3632_v57  ;;  %2364 = vmatpush.bf16.msrb.mxu3 %v3760_v7 }
 0x20d   :  { %2326 = vmatpush.bf16.msrb.mxu0 %v3360_v63  ;;  %2339 = vmatpush.bf16.msrb.mxu1 %v3488_v0  ;;  %v2120_v4 = vpop.f32.mrf.mxu0  ;;  %v2133_v15 = vpop.f32.mrf.mxu1 }
 0x20e   :  { %2352 = vmatpush.bf16.msrb.mxu2 %v3616_v11  ;;  %2365 = vmatpush.bf16.msrb.mxu3 %v3744_v1  ;;  %v2121_v24 = vadd.f32 %v2120_v4, %v2108_v44 }
 0x210   :  { %2327 = vmatmul.bf16.vlgmr.msrb.gmra.mxu0 %v4612_v14  ;;  %2340 = vmatmul.bf16.vlgmr.msrb.gmra.mxu1 %v4614_v18  ;;  %v2134_v5 = vadd.f32 %v2133_v15, %v2121_v24  ;;  %v669_v14 = vperm.slane %v4639_v28, 2  ;;  %v2376_v15 = vmul.f32 %v4646_v37, %v4646_v37 }
 0x211   :  { %2353 = vmatmul.bf16.vlgmr.msrb.gmra.mxu2 %v4616_v22  ;;  %2366 = vmatmul.bf16.vlgmr.msrb.gmra.mxu3 %v4618_v23 }
 0x215   :  { %v2122_v19 = vpop.f32.mrf.mxu0  ;;  %v2135_v20 = vpop.f32.mrf.mxu1 }
 0x216   :  { %v2146_v10 = vpop.f32.mrf.mxu2  ;;  %v2159_v12 = vpop.f32.mrf.mxu3 }
 0x217   :  { %v2147_v13 = vadd.f32 %v2146_v10, %v2134_v5 }
 0x219   :  { %v4657_v21 = vadd.f32 %v2159_v12, %v2147_v13 }
 0x21b   :  { %v2371_v63 = vadd.f32 %v4657_v21, %v4646_v37  ;;  %v2377_v1 = vmul.f32 %v4657_v21, %v4657_v21 }
 0x21d   :  { %v2380_v13 = vadd.f32 %v2377_v1, %v2376_v15 }
 0x21e   :  { %v2148_v25 = vpop.f32.mrf.mxu2  ;;  %v2161_v26 = vpop.f32.mrf.mxu3 }
 0x21f   :  { %v4264_v25 = vld [vmem:[%s4795_s9 + $0x38] sm:$0xff] }
 0x220   :  { %v4272_v26 = vld [vmem:[%s4795_s9 + $0x78] sm:$0xff]  ;;  %2702 = vmatpush.bf16.msra.mxu0 %v4264_v25 }
 0x221   :  { %2715 = vmatpush.bf16.msra.mxu1 %v4272_v26 }
 0x22d   :  { %v2172_v18 = vpop.f32.mrf.mxu0  ;;  %v2185_v27 = vpop.f32.mrf.mxu1 }
 0x22e   :  { %v2173_v22 = vadd.f32 %v2172_v18, %v669_v14  ;;  %v4280_v14 = vld [vmem:[%s4795_s9 + $0xb8] sm:$0xff] }
 0x22f   :  { %v4288_v18 = vld [vmem:[%s4795_s9 + $0xf8] sm:$0xff]  ;;  %2728 = vmatpush.bf16.msra.mxu2 %v4280_v14 }
 0x230   :  { %v2186_v2 = vadd.f32 %v2185_v27, %v2173_v22  ;;  %2741 = vmatpush.bf16.msra.mxu3 %v4288_v18  ;;  %v4263_v27 = vld [vmem:[%s4795_s9 + $0x30] sm:$0xff] }
 0x231   :  { %v4271_v22 = vld [vmem:[%s4795_s9 + $0x70] sm:$0xff]  ;;  %2703 = vmatpush.bf16.msra.mxu0 %v4263_v27 }
 0x232   :  { %2716 = vmatpush.bf16.msra.mxu1 %v4271_v22 }
 0x235   :  { %v2174_v29 = vpop.f32.mrf.mxu0  ;;  %v2187_v16 = vpop.f32.mrf.mxu1 }
 0x236   :  { %v2198_v23 = vpop.f32.mrf.mxu2  ;;  %v2211_v3 = vpop.f32.mrf.mxu3  ;;  %v4278_v29 = vld [vmem:[%s4795_s9 + $0xa8] sm:$0xff] }
 0x237   :  { %v2199_v17 = vadd.f32 %v2198_v23, %v2186_v2  ;;  %v4279_v2 = vld [vmem:[%s4795_s9 + $0xb0] sm:$0xff]  ;;  %v4286_v16 = vld [vmem:[%s4795_s9 + $0xe8] sm:$0xff] }
 0x238   :  { %v4287_v23 = vld [vmem:[%s4795_s9 + $0xf0] sm:$0xff]  ;;  %2729 = vmatpush.bf16.msra.mxu2 %v4279_v2 }
 0x239   :  { %v2212_v30 = vadd.f32 %v2211_v3, %v2199_v17  ;;  %2742 = vmatpush.bf16.msra.mxu3 %v4287_v23  ;;  %v4262_v3 = vld [vmem:[%s4795_s9 + $0x28] sm:$0xff] }
 0x23a   :  { %v4270_v17 = vld [vmem:[%s4795_s9 + $0x68] sm:$0xff]  ;;  %2704 = vmatpush.bf16.msra.mxu0 %v4262_v3 }
 0x23b   :  { %2717 = vmatpush.bf16.msra.mxu1 %v4270_v17 }
 0x23c   :  { %2730 = vmatpush.bf16.msra.mxu2 %v4278_v29 }
 0x23d   :  { %2743 = vmatpush.bf16.msra.mxu3 %v4286_v16 }
 0x23e   :  { %v2200_v31 = vpop.f32.mrf.mxu2  ;;  %v2213_v32 = vpop.f32.mrf.mxu3 }
 0x23f   :  { %v4269_v31 = vld [vmem:[%s4795_s9 + $0x60] sm:$0xff] }
 0x240   :  { %v4277_v32 = vld [vmem:[%s4795_s9 + $0xa0] sm:$0xff]  ;;  %2718 = vmatpush.bf16.msra.mxu1 %v4269_v31 }
 0x241   :  { %2731 = vmatpush.bf16.msra.mxu2 %v4277_v32 }
 0x24d   :  { %v2224_v34 = vpop.f32.mrf.mxu0  ;;  %v2237_v33 = vpop.f32.mrf.mxu1 }
 0x24e   :  { %v2225_v51 = vadd.f32 %v2224_v34, %v2212_v30  ;;  %v4261_v30 = vld [vmem:[%s4795_s9 + $0x20] sm:$0xff] }
 0x24f   :  { %v4285_v34 = vld [vmem:[%s4795_s9 + $0xe0] sm:$0xff]  ;;  %2705 = vmatpush.bf16.msra.mxu0 %v4261_v30 }
 0x250   :  { %v2238_v55 = vadd.f32 %v2237_v33, %v2225_v51  ;;  %2744 = vmatpush.bf16.msra.mxu3 %v4285_v34  ;;  %v4260_v33 = vld [vmem:[%s4795_s9 + $0x18] sm:$0xff] }
 0x253   :  { %2706 = vmatpush.bf16.msra.mxu0 %v4260_v33 }
 0x255   :  { %v2226_v38 = vpop.f32.mrf.mxu0  ;;  %v2239_v39 = vpop.f32.mrf.mxu1 }
 0x256   :  { %v2250_v35 = vpop.f32.mrf.mxu2  ;;  %v2263_v36 = vpop.f32.mrf.mxu3  ;;  %v4284_v38 = vld [vmem:[%s4795_s9 + $0xd8] sm:$0xff] }
 0x257   :  { %v2251_v59 = vadd.f32 %v2250_v35, %v2238_v55  ;;  %v4268_v35 = vld [vmem:[%s4795_s9 + $0x58] sm:$0xff]  ;;  %2745 = vmatpush.bf16.msra.mxu3 %v4284_v38  ;;  %v4281_v55 = vld [vmem:[%s4795_s9 + $0xc0] sm:$0xff] }
 0x258   :  { %2719 = vmatpush.bf16.msra.mxu1 %v4268_v35  ;;  %v4292_v35 = vld [vmem:[#allocation2] ss:$0 sm:$0xff] }
 0x259   :  { %v4661_v58 = vadd.f32 %v2263_v36, %v2251_v59  ;;  %v4276_v36 = vld [vmem:[%s4795_s9 + $0x98] sm:$0xff] }
 0x25a   :  { %2732 = vmatpush.bf16.msra.mxu2 %v4276_v36 }
 0x25b   :  { %v2372_v11 = vadd.f32 %v2371_v63, %v4661_v58  ;;  %v2378_v24 = vmul.f32 %v4661_v58, %v4661_v58 }
 0x25d   :  { %v2381_v19 = vadd.f32 %v2380_v13, %v2378_v24 }
 0x25e   :  { %v2252_v40 = vpop.f32.mrf.mxu2  ;;  %v2265_v41 = vpop.f32.mrf.mxu3 }
 0x25f   :  { %v4259_v40 = vld [vmem:[%s4795_s9 + $0x10] sm:$0xff] }
 0x260   :  { %v4267_v41 = vld [vmem:[%s4795_s9 + $0x50] sm:$0xff]  ;;  %2707 = vmatpush.bf16.msra.mxu0 %v4259_v40 }
 0x261   :  { %2720 = vmatpush.bf16.msra.mxu1 %v4267_v41 }
 0x26d   :  { %v2276_v42 = vpop.f32.mrf.mxu0  ;;  %v2289_v43 = vpop.f32.mrf.mxu1 }
 0x26e   :  { %v2277_v52 = vadd.f32 %v2276_v42, %v670_v48  ;;  %v4275_v42 = vld [vmem:[%s4795_s9 + $0x90] sm:$0xff]  ;;  %v4282_v48 = vld [vmem:[%s4795_s9 + $0xc8] sm:$0xff] }
 0x26f   :  { %2733 = vmatpush.bf16.msra.mxu2 %v4275_v42 }
 0x270   :  { %v2290_v53 = vadd.f32 %v2289_v43, %v2277_v52  ;;  %v4283_v43 = vld [vmem:[%s4795_s9 + $0xd0] sm:$0xff]  ;;  %v4265_v52 = vld [vmem:[%s4795_s9 + $0x40] sm:$0xff] }
 0x271   :  { %2746 = vmatpush.bf16.msra.mxu3 %v4283_v43 }
 0x275   :  { %v2278_v46 = vpop.f32.mrf.mxu0  ;;  %v2291_v47 = vpop.f32.mrf.mxu1  ;;  %2747 = vmatpush.bf16.msra.mxu3 %v4282_v48 }
 0x276   :  { %v2302_v44 = vpop.f32.mrf.mxu2  ;;  %v2315_v45 = vpop.f32.mrf.mxu3  ;;  %v4274_v46 = vld [vmem:[%s4795_s9 + $0x88] sm:$0xff] }
 0x277   :  { %v2303_v54 = vadd.f32 %v2302_v44, %v2290_v53  ;;  %v4258_v44 = vld [vmem:[%s4795_s9 + $0x8] sm:$0xff]  ;;  %2734 = vmatpush.bf16.msra.mxu2 %v4274_v46  ;;  %v4273_v53 = vld [vmem:[%s4795_s9 + $0x80] sm:$0xff] }
 0x278   :  { %2708 = vmatpush.bf16.msra.mxu0 %v4258_v44 }
 0x279   :  { %v2316_v56 = vadd.f32 %v2315_v45, %v2303_v54  ;;  %v4266_v45 = vld [vmem:[%s4795_s9 + $0x48] sm:$0xff]  ;;  %2748 = vmatpush.bf16.msra.mxu3 %v4281_v55 }
 0x27a   :  { %2721 = vmatpush.bf16.msra.mxu1 %v4266_v45 }
 0x27b   :  { %2735 = vmatpush.bf16.msra.mxu2 %v4273_v53 }
 0x27e   :  { %v2304_v49 = vpop.f32.mrf.mxu2  ;;  %v2317_v50 = vpop.f32.mrf.mxu3  ;;  %2722 = vmatpush.bf16.msra.mxu1 %v4265_v52 }
 0x27f   :  { %v4257_v49 = vld [vmem:[%s4795_s9] sm:$0xff] }
 0x280   :  { %2709 = vmatpush.bf16.msra.mxu0 %v4257_v49 }
 0x28d   :  { %v2328_v57 = vpop.f32.mrf.mxu0  ;;  %v2341_v7 = vpop.f32.mrf.mxu1 }
 0x28e   :  { %v2329_v60 = vadd.f32 %v2328_v57, %v2316_v56 }
 0x290   :  { %v2342_v8 = vadd.f32 %v2341_v7, %v2329_v60 }
 0x294   :  { %v2354_v61 = vpop.f32.mrf.mxu2  ;;  %v2367_v9 = vpop.f32.mrf.mxu3 }
 0x295   :  { %v2355_v62 = vadd.f32 %v2354_v61, %v2342_v8  ;;  %v2330_v6 = vpop.f32.mrf.mxu0  ;;  %v2343_v28 = vpop.f32.mrf.mxu1 }
 0x296   :  { %v62_v6 = vld [vmem:[%s4794_s8] sm:$0xf] }
 0x297   :  { %v4665_v0 = vadd.f32 %v2367_v9, %v2355_v62  ;;  %v61_v9 = vld [vmem:[%s4793_s7] sm:$0xf]  ;;  %v2423_v24 = vperm.slane %v62_v6, 0  ;;  %v2426_v25 = vperm.slane %v62_v6, 3 }
 0x298   :  { %v2410_v15 = vperm.slane %v61_v9, 0 }
 0x299   :  { %v2373_v4 = vadd.f32 %v2372_v11, %v4665_v0  ;;  %v2379_v12 = vmul.f32 %v4665_v0, %v4665_v0 }
 0x29b   :  { %2374 = vadd.xlane.f32.xlu1 %v2373_v4  ;;  %v2382_v20 = vadd.f32 %v2381_v19, %v2379_v12  ;;  %v2413_v12 = vperm.slane %v61_v9, 3  ;;  %v2424_v19 = vperm.slane %v62_v6, 1 }
 0x29c   :  { %v2356_v5 = vpop.f32.mrf.mxu2  ;;  %v2369_v10 = vpop.f32.mrf.mxu3 }
 0x29d   :  { %v2411_v5 = vperm.slane %v61_v9, 1  ;;  %v2412_v10 = vperm.slane %v61_v9, 2 }
 0x2a3   :  { %2383 = vadd.xlane.f32.xlu1 %v2382_v20  ;;  %v2425_v20 = vperm.slane %v62_v6, 2 }
 0x30e   :  { %v2375_v39 = vpop.xlane.xlu1 %2374 }
 0x30f   :  { %v2385_v47 = vmul.f32 0.001953125, %v2375_v39 }
 0x311   :  { %v2387_v51 = vmul.f32 %v2385_v47, %v2385_v47  ;;  %v2390_v28 = vsub.f32 %v4646_v37, %v2385_v47  ;;  %v2391_v63 = vsub.f32 %v4657_v21, %v2385_v47  ;;  %v2392_v11 = vsub.f32 %v4661_v58, %v2385_v47 }
 0x312   :  { %v2393_v1 = vsub.f32 %v4665_v0, %v2385_v47 }
 0x316   :  { %v2384_v50 = vpop.xlane.xlu1 %2383 }
 0x317   :  { %v2386_v54 = vmul.f32 0.001953125, %v2384_v50 }
 0x319   :  { %v2388_v56 = vsub.f32 %v2386_v54, %v2387_v51 }
 0x31b   :  { %v2389_v57 = vmax.f32 %v2388_v56, 0.0 }
 0x31d   :  { %v2394_v7 = vadd.f32 1e-05, %v2389_v57 }
 0x31f   :  { %4295 = vrsqrt.f32 %v2394_v7  ;;  %vm2401_vm5 = vweird.f32 %v2394_v7 }
 0x325   :  { %v4296_v59 = vpop.eup %4295 }
 0x326   :  { %v2396_v60 = vmul.f32 %v4296_v59, %v2394_v7  ;;  %vm2402_vm4 = vweird.f32 %v4296_v59 }
 0x327   :  { %vm2403_vm6 = vmor %vm2401_vm5, %vm2402_vm4 }
 0x328   :  { %v2397_v8 = vmul.f32 %v4296_v59, %v2396_v60 }
 0x32a   :  { %v2398_v61 = vmul.f32 0.5, %v2397_v8 }
 0x32c   :  { %v2399_v62 = vsub.f32 1.5, %v2398_v61 }
 0x32e   :  { %v2400_v4 = vmul.f32 %v4296_v59, %v2399_v62 }
 0x330   :  { %v2404_v13 = vsel %vm2403_vm6, %v4296_v59, %v2400_v4 }
 0x331   :  { %v2405_v26 = vmul.f32 %v2404_v13, %v2390_v28  ;;  %v2406_v37 = vmul.f32 %v2404_v13, %v2391_v63  ;;  %v2407_v14 = vmul.f32 %v2404_v13, %v2392_v11  ;;  %v2408_v21 = vmul.f32 %v2404_v13, %v2393_v1 }
 0x333   :  { %v2418_v18 = vmul.f32 %v2410_v15, %v2405_v26  ;;  %v2419_v58 = vmul.f32 %v2411_v5, %v2406_v37  ;;  %v2420_v27 = vmul.f32 %v2412_v10, %v2407_v14  ;;  %v2421_v0 = vmul.f32 %v2413_v12, %v2408_v21 }
 0x335   :  { %v2431_v22 = vadd.f32 %v2423_v24, %v2418_v18  ;;  %v2432_v2 = vadd.f32 %v2424_v19, %v2419_v58  ;;  %v2433_v23 = vadd.f32 %v2425_v20, %v2420_v27  ;;  %v2434_v3 = vadd.f32 %v2426_v25, %v2421_v0 }
 0x337   :  { %v2435_v17 = vmax.f32 %v2431_v22, 0.0  ;;  %v2436_v29 = vmax.f32 %v2432_v2, 0.0  ;;  %v2437_v16 = vmax.f32 %v2433_v23, 0.0  ;;  %v2438_v30 = vmax.f32 %v2434_v3, 0.0 }
 0x339   :  { %v2439_v31 = vpack.c.bf16 %v2435_v17, %v2435_v17  ;;  %v2440_v32 = vpack.c.bf16 %v2436_v29, %v2436_v29  ;;  %v2441_v34 = vpack.c.bf16 %v2437_v16, %v2437_v16  ;;  %v2442_v33 = vpack.c.bf16 %v2438_v30, %v2438_v30 }
 0x33b   :  { %2710 = vmatmul.bf16.vlgmr.msra.gmra.mxu0 %v2439_v31  ;;  %2723 = vmatmul.bf16.vlgmr.msra.gmra.mxu1 %v2440_v32 }
 0x33c   :  { %2736 = vmatmul.bf16.vlgmr.msra.gmra.mxu2 %v2441_v34  ;;  %2749 = vmatmul.bf16.vlgmr.msra.gmra.mxu3 %v2442_v33 }
 0x3b8   :  { %v2711_v36 = vpop.f32.mrf.mxu0  ;;  %v2724_v38 = vpop.f32.mrf.mxu1 }
 0x3b9   :  { %v2712_v39 = vadd.f32 %v4292_v35, %v2711_v36 }
 0x3bb   :  { %v2725_v40 = vadd.f32 %v2724_v38, %v2712_v39 }
 0x3bf   :  { %v2737_v41 = vpop.f32.mrf.mxu2  ;;  %v2750_v42 = vpop.f32.mrf.mxu3 }
 0x3c0   :  { %v2738_v43 = vadd.f32 %v2737_v41, %v2725_v40  ;;  %v2713_v44 = vpop.f32.mrf.mxu0  ;;  %v2726_v45 = vpop.f32.mrf.mxu1 }
 0x3c2   :  { %v2751_v46 = vadd.f32 %v2750_v42, %v2738_v43 }
 0x3c4   :  { %2755 = vst.msk [vmem:[%s4797_s11] sm:$0xff] %vm2754_vm7, %v2751_v46 }
 0x3c7   :  { %v2739_v47 = vpop.f32.mrf.mxu2  ;;  %v2752_v48 = vpop.f32.mrf.mxu3 }
 0x3c8   :  { %2760 = vsyncpa [#allocation4], 1 }

</bundles_post_ra>
